<compile_context>
chip_gen: v6e
topology: v6e:2x2x1
jax: 0.10.0
libtpu: 0.0.40
codegen_flags: <defaults>
</compile_context>

<pallas_src>
import math
import functools

import jax
import jax.numpy as jnp
from jax.experimental import pallas as pl
from jax.experimental.pallas import tpu as pltpu

EPS = 1e-5                       # nn.BatchNorm2d default eps
ACT_DTYPE = jnp.bfloat16         # HBM activation / MXU operand dtype
WGT_DTYPE = jnp.bfloat16         # MXU weight dtype (biases / depthwise taps stay f32)
VMEM_LIMIT = 32 * 1024 * 1024    # safe on v5e/v6e/v7x; actual use here is a few MiB


def _compiler_params():
    return pltpu.CompilerParams(dimension_semantics=("parallel",),
                                vmem_limit_bytes=VMEM_LIMIT)


def _const_index_map(ndim):
    zeros = (0,) * ndim
    return lambda b: zeros


# ----------------------------- in-kernel helpers ------------------------------

def _zero_halo(pad_ref, H, W, p):
    """Zero only the p-wide halo of a (H+2p, W+2p, C) padded scratch.  The interior is
    fully overwritten before every read, so no full-slab memset is needed."""
    Hp, Wp, C = pad_ref.shape
    dt = pad_ref.dtype
    pad_ref[0:p, :, :] = jnp.zeros((p, Wp, C), dt)
    pad_ref[p + H:Hp, :, :] = jnp.zeros((Hp - p - H, Wp, C), dt)
    pad_ref[p:p + H, 0:p, :] = jnp.zeros((H, p, C), dt)
    pad_ref[p:p + H, p + W:Wp, :] = jnp.zeros((H, Wp - p - W, C), dt)


def _dw3x3_relu6(y, pad_ref, wd_ref, db_ref, H, W, c):
    """3x3 depthwise (+folded BN bias) + ReLU6 on a VMEM-resident (HW, c) f32 value.
    pad_ref is a shared (H+2, W+2, >=c) f32 scratch whose halo is already zero."""
    pad_ref[1:H + 1, 1:W + 1, :c] = y.reshape(H, W, c)
    acc = pad_ref[0:H, 0:W, :c] * wd_ref[0]
    for t in range(1, 9):
        dy, dx = divmod(t, 3)
        acc = acc + pad_ref[dy:dy + H, dx:dx + W, :c] * wd_ref[t]
    return jnp.clip(acc + db_ref[...], 0.0, 6.0).reshape(H * W, c)


def _im2col3(y, pad_ref, H, W, c):
    """(HW, 9*c) bf16 im2col patch slab for a 3x3/pad-1 conv of the VMEM-resident (HW, c)
    f32 value y -> one big-K MXU matmul instead of 9 small K=c ones."""
    pad_ref[1:H + 1, 1:W + 1, :c] = y.reshape(H, W, c)
    taps = []
    for t in range(9):
        dy, dx = divmod(t, 3)
        taps.append(pad_ref[dy:dy + H, dx:dx + W, :c].reshape(H * W, c))
    return jnp.concatenate(taps, axis=-1).astype(ACT_DTYPE)


# ------------------------------ Pallas kernels -------------------------------

def _ghost_kernel(*refs, H, W, has_skip):
    """Fused GhostConv (1x1 primary+BN+ReLU6 -> 3x3 cheap depthwise+BN+ReLU6 -> concat),
    with an optional fused '+ skip' add (the upsampled coarser pyramid level)."""
    x_ref, wp, bp, wd, bd = refs[:5]
    idx = 5
    skip_ref = None
    if has_skip:
        skip_ref = refs[idx]
        idx += 1
    o_ref = refs[idx]
    pad_f = refs[idx + 1]
    init_ch = bp.shape[-1]

    _zero_halo(pad_f, H, W, 1)
    x = x_ref[0]                                                     # (HW, cin) bf16
    y1 = jnp.clip(jnp.dot(x, wp[...], preferred_element_type=jnp.float32)
                  + bp[...], 0.0, 6.0)                               # (HW, init) f32
    y2 = _dw3x3_relu6(y1, pad_f, wd, bd, H, W, init_ch)              # (HW, init) f32
    out = jnp.concatenate([y1, y2], axis=-1)                         # (HW, 2*init)
    if has_skip:
        out = out + skip_ref[0].astype(jnp.float32)
    o_ref[0] = out.astype(o_ref.dtype)


def _csp_kernel(*refs, H, W, c, n_m, m_k):
    """One fused CSPBlock: packed cv1|cv2 primary (K=c, N=c/2 matmul) -> packed cheap
    depthwise -> m[] ghost chain (big-K im2col matmul when m_k==3) -> cv3 on the
    in-VMEM concat.  All intermediates stay in VMEM (f32); one output store."""
    half, quarter = c // 2, c // 4
    x_ref = refs[0]
    w12, b12, d12, e12 = refs[1:5]
    m_refs = refs[5:5 + 4 * n_m]
    w3, b3, d3, e3 = refs[5 + 4 * n_m:9 + 4 * n_m]
    o_ref = refs[9 + 4 * n_m]
    pad_f = refs[10 + 4 * n_m]

    _zero_halo(pad_f, H, W, 1)       # once per invocation; shared by all dw/im2col below

    x = x_ref[0]                                                     # (HW, c) bf16
    # cv1|cv2 packed primary 1x1 conv: one (HW,c)x(c,half) MXU matmul
    y1 = jnp.clip(jnp.dot(x, w12[...], preferred_element_type=jnp.float32)
                  + b12[...], 0.0, 6.0)                              # (HW, half) f32
    # cv1|cv2 packed cheap depthwise (per-channel -> packing is exact)
    y2 = _dw3x3_relu6(y1, pad_f, d12, e12, H, W, half)               # (HW, half) f32

    # cv1 branch output (first `quarter` channels of each packed half)
    a = jnp.concatenate([y1[:, :quarter], y2[:, :quarter]], axis=-1)  # (HW, half) f32

    for i in range(n_m):                                             # m ghost chain
        wm, bm, dm, em = m_refs[4 * i:4 * i + 4]
        if m_k == 1:
            p = jnp.dot(a.astype(ACT_DTYPE), wm[...],
                        preferred_element_type=jnp.float32)
        else:   # m_k == 3: single big-K (9*half) im2col matmul
            p = jnp.dot(_im2col3(a, pad_f, H, W, half), wm[...],
                        preferred_element_type=jnp.float32)
        p = jnp.clip(p + bm[...], 0.0, 6.0)                          # (HW, quarter) f32
        q = _dw3x3_relu6(p, pad_f, dm, em, H, W, quarter)
        a = jnp.concatenate([p, q], axis=-1)                         # (HW, half) f32

    # cv3 on cat(m(cv1(x)), cv2(x)) -- the concat never leaves VMEM; K=c matmul
    z = jnp.concatenate([a, y1[:, quarter:], y2[:, quarter:]],
                        axis=-1).astype(ACT_DTYPE)                   # (HW, c) bf16
    u1 = jnp.clip(jnp.dot(z, w3[...], preferred_element_type=jnp.float32)
                  + b3[...], 0.0, 6.0)                               # (HW, half) f32
    u2 = _dw3x3_relu6(u1, pad_f, d3, e3, H, W, half)
    o_ref[0] = jnp.concatenate([u1, u2], axis=-1).astype(o_ref.dtype)


def _dw_conv_kernel(*refs, k, H, W, has_skip):
    """DWConv kxk (+folded BN) + ReLU6, optional fused '+ skip' (pooled finer level)."""
    x_ref, wd, bd = refs[:3]
    idx = 3
    skip_ref = None
    if has_skip:
        skip_ref = refs[idx]
        idx += 1
    o_ref = refs[idx]
    pad_f = refs[idx + 1]
    C = x_ref.shape[-1]
    p = k // 2

    _zero_halo(pad_f, H, W, p)
    pad_f[p:p + H, p:p + W, :] = x_ref[0].astype(jnp.float32).reshape(H, W, C)
    acc = pad_f[0:H, 0:W, :] * wd[0]
    for t in range(1, k * k):
        dy, dx = divmod(t, k)
        acc = acc + pad_f[dy:dy + H, dx:dx + W, :] * wd[t]
    y = jnp.clip(acc + bd[...], 0.0, 6.0).reshape(H * W, C)
    if has_skip:
        y = y + skip_ref[0].astype(jnp.float32)
    o_ref[0] = y.astype(o_ref.dtype)


# ------------------------------ kernel wrappers -------------------------------

def ghost_conv(x, hw, p, skip=None, out_dtype=ACT_DTYPE):
    """Fused GhostConv(1x1) pallas_call over the batch grid, optional fused skip add."""
    H, W = hw
    n, HW, cin = x.shape
    init_ch = p["pb"].shape[-1]
    cout = 2 * init_ch
    assert p["pw"].shape == (cin, init_ch)        # reduce convs are 1x1

    in_specs = [pl.BlockSpec((1, HW, cin), lambda b: (b, 0, 0))]
    args = [x.astype(ACT_DTYPE)]
    for key in ("pw", "pb", "dw", "db"):
        arr = p[key]
        in_specs.append(pl.BlockSpec(arr.shape, _const_index_map(arr.ndim)))
        args.append(arr)
    if skip is not None:
        in_specs.append(pl.BlockSpec((1, HW, cout), lambda b: (b, 0, 0)))
        args.append(skip.astype(ACT_DTYPE))

    kern = functools.partial(_ghost_kernel, H=H, W=W, has_skip=skip is not None)
    return pl.pallas_call(
        kern,
        grid=(n,),
        in_specs=in_specs,
        out_specs=pl.BlockSpec((1, HW, cout), lambda b: (b, 0, 0)),
        out_shape=jax.ShapeDtypeStruct((n, HW, cout), out_dtype),
        scratch_shapes=[pltpu.VMEM((H + 2, W + 2, init_ch), jnp.float32)],
        compiler_params=_compiler_params(),
    )(*args)


def csp_block(x, hw, p, out_dtype=ACT_DTYPE):
    """Whole CSPBlock as one fused pallas_call (intermediates never leave VMEM)."""
    H, W = hw
    n, HW, c = x.shape
    half = c // 2
    n_m = len(p["m"])
    m_k = int(math.isqrt(p["m"][0]["pw"].shape[0] // half))

    in_specs = [pl.BlockSpec((1, HW, c), lambda b: (b, 0, 0))]
    args = [x.astype(ACT_DTYPE)]

    def add_group(g):
        for key in ("pw", "pb", "dw", "db"):
            arr = g[key]
            in_specs.append(pl.BlockSpec(arr.shape, _const_index_map(arr.ndim)))
            args.append(arr)

    add_group(p["cv12"])
    for mg in p["m"]:
        add_group(mg)
    add_group(p["cv3"])

    kern = functools.partial(_csp_kernel, H=H, W=W, c=c, n_m=n_m, m_k=m_k)
    return pl.pallas_call(
        kern,
        grid=(n,),
        in_specs=in_specs,
        out_specs=pl.BlockSpec((1, HW, c), lambda b: (b, 0, 0)),
        out_shape=jax.ShapeDtypeStruct((n, HW, c), out_dtype),
        scratch_shapes=[pltpu.VMEM((H + 2, W + 2, half), jnp.float32)],
        compiler_params=_compiler_params(),
    )(*args)


def dw_conv(x, hw, p, skip=None, out_dtype=ACT_DTYPE):
    """Fused DWConv(k=5)+BN+ReLU6 pallas_call, optional fused '+ skip' add."""
    H, W = hw
    n, HW, C = x.shape
    k = int(math.isqrt(p["w"].shape[0]))
    pad = k // 2

    in_specs = [pl.BlockSpec((1, HW, C), lambda b: (b, 0, 0)),
                pl.BlockSpec(p["w"].shape, _const_index_map(p["w"].ndim)),
                pl.BlockSpec(p["b"].shape, _const_index_map(p["b"].ndim))]
    args = [x.astype(ACT_DTYPE), p["w"], p["b"]]
    if skip is not None:
        in_specs.append(pl.BlockSpec((1, HW, C), lambda b: (b, 0, 0)))
        args.append(skip.astype(ACT_DTYPE))

    kern = functools.partial(_dw_conv_kernel, k=k, H=H, W=W,
                             has_skip=skip is not None)
    return pl.pallas_call(
        kern,
        grid=(n,),
        in_specs=in_specs,
        out_specs=pl.BlockSpec((1, HW, C), lambda b: (b, 0, 0)),
        out_shape=jax.ShapeDtypeStruct((n, HW, C), out_dtype),
        scratch_shapes=[pltpu.VMEM((H + 2 * pad, W + 2 * pad, C), jnp.float32)],
        compiler_params=_compiler_params(),
    )(*args)


# -------------------------------- XLA glue ------------------------------------

def upsample2(x, hw):
    """Nearest 2x upsample of a (N, H*W, C) row slab -> (N, 4*H*W, C)."""
    H, W = hw
    n, HW, C = x.shape
    x4 = x.reshape(n, H, W, C)
    x4 = jnp.repeat(jnp.repeat(x4, 2, axis=1), 2, axis=2)
    return x4.reshape(n, 4 * HW, C)


def maxpool2(x, hw):
    """2x2 max pool of a (N, H*W, C) row slab -> (N, H*W/4, C)."""
    H, W = hw
    n, HW, C = x.shape
    x6 = x.reshape(n, H // 2, 2, W // 2, 2, C).max(axis=(2, 4))
    return x6.reshape(n, (H // 2) * (W // 2), C)


# ------------------------------ parameter setup -------------------------------

class KeyGen:
    def __init__(self, key):
        self._key = key

    def __call__(self):
        self._key, sub = jax.random.split(self._key)
        return sub


def _bn_fold(kg, c, zero_gamma=False):
    gamma = jnp.zeros((c,), jnp.float32) if zero_gamma else jnp.ones((c,), jnp.float32)
    beta = 0.05 * jax.random.normal(kg(), (c,), jnp.float32)
    mean = 0.05 * jax.random.normal(kg(), (c,), jnp.float32)
    var = 1.0 + 0.1 * jax.random.uniform(kg(), (c,), jnp.float32)
    scale = gamma / jnp.sqrt(var + EPS)
    bias = beta - mean * scale
    return scale, bias


def make_ghost_params(kg, c_in, c_out, k=1, dw_size=3, zero_bn=False):
    init_ch = min(math.ceil(c_out / 2), c_out)
    cheap_ch = c_out - init_ch
    # TODO(synk): odd c_out makes the cheap branch a grouped (non-plain-depthwise) conv;
    #             only the even-c_out case (cheap_ch == init_ch) is implemented.
    assert cheap_ch == init_ch
    w = 0.1 * jax.random.normal(kg(), (k * k, c_in, init_ch), jnp.float32)
    s, b = _bn_fold(kg, init_ch, zero_gamma=zero_bn)
    dw = 0.1 * jax.random.normal(kg(), (dw_size * dw_size, 1, 1, init_ch), jnp.float32)
    s2, b2 = _bn_fold(kg, cheap_ch, zero_gamma=zero_bn)
    return {"pw": (w * s).reshape(k * k * c_in, init_ch).astype(WGT_DTYPE),
            "pb": b.reshape(1, init_ch),               # f32
            "dw": dw * s2,                             # (9,1,1,init) f32
            "db": b2.reshape(1, 1, cheap_ch)}          # f32


def make_dw_params(kg, c, k=5):
    w = 0.1 * jax.random.normal(kg(), (k * k, 1, 1, c), jnp.float32)
    s, b = _bn_fold(kg, c)
    return {"w": w * s, "b": b.reshape(1, 1, c)}


def make_csp_params(kg, c, n=1, m_k=1, zero_bn_cv3=True):
    cv1 = make_ghost_params(kg, c, c // 2, 1)
    cv2 = make_ghost_params(kg, c, c // 2, 1)
    # pack cv1|cv2 along the output-channel axis (exact: 1x1 conv + per-channel depthwise)
    cv12 = {"pw": jnp.concatenate([cv1["pw"], cv2["pw"]], axis=-1),
            "pb": jnp.concatenate([cv1["pb"], cv2["pb"]], axis=-1),
            "dw": jnp.concatenate([cv1["dw"], cv2["dw"]], axis=-1),
            "db": jnp.concatenate([cv1["db"], cv2["db"]], axis=-1)}
    m = [make_ghost_params(kg, c // 2, c // 2, k=m_k) for _ in range(n)]
    # CSPBlock.__init__ zero-inits all BN weights inside cv3
    cv3 = make_ghost_params(kg, c, c, 1, zero_bn=zero_bn_cv3)
    return {"cv1": cv1, "cv2": cv2, "cv12": cv12, "m": m, "cv3": cv3}


def build_csppan_params(key, in_chs, out_ch):
    kg = KeyGen(key)
    last = len(in_chs) - 1
    return {"reduce": [make_ghost_params(kg, c, out_ch, 1) for c in in_chs],
            "lat": [make_dw_params(kg, out_ch, 5) for _ in in_chs[:-1]],
            "out": [make_csp_params(kg, out_ch,
                                    n=2 if i == last else 1,
                                    m_k=3 if i == last else 1)
                    for i in range(len(in_chs))]}


# --------------------------------- forward ------------------------------------

def _to_rows(x):                      # NCHW -> (N, H*W, C) bf16 row slabs
    n, c, h, w = x.shape
    return jnp.transpose(x, (0, 2, 3, 1)).reshape(n, h * w, c).astype(ACT_DTYPE)


def _to_nchw(x, hw):
    H, W = hw
    n, HW, C = x.shape
    return jnp.transpose(x.reshape(n, H, W, C), (0, 3, 1, 2))


def csppan_forward(c3, c4, c5, params, hw3):
    """c3,c4,c5: NCHW float32 (as in the torch module).  Returns NCHW float32 p3,p4,p5."""
    H3, W3 = hw3
    hw4 = (H3 // 2, W3 // 2)
    hw5 = (H3 // 4, W3 // 4)

    x3, x4, x5 = _to_rows(c3), _to_rows(c4), _to_rows(c5)
    nk = params

    p5 = ghost_conv(x5, hw5, nk["reduce"][2])
    p4 = ghost_conv(x4, hw4, nk["reduce"][1], skip=upsample2(p5, hw5))
    p3 = ghost_conv(x3, hw3, nk["reduce"][0], skip=upsample2(p4, hw4))

    p3 = dw_conv(p3, hw3, nk["lat"][0])
    p4 = dw_conv(p4, hw4, nk["lat"][1], skip=maxpool2(p3, hw3))   # fused "+ maxpool(p3)"
    p5 = p5 + maxpool2(p4, hw4)                                    # tiny XLA fusion

    o3 = csp_block(p3, hw3, nk["out"][0], out_dtype=jnp.float32)
    o4 = csp_block(p4, hw4, nk["out"][1], out_dtype=jnp.float32)
    o5 = csp_block(p5, hw5, nk["out"][2], out_dtype=jnp.float32)

    return _to_nchw(o3, hw3), _to_nchw(o4, hw4), _to_nchw(o5, hw5)


# --------------------------- pure-JAX reference path --------------------------
# Mirrors the kernels' dtype boundaries (bf16 HBM slabs / MXU operands, f32 math) so the
# comparison tolerance only has to cover accumulation-order differences.

def _ref_ghost_core(x, hw, p):
    H, W = hw
    n, HW, cin = x.shape
    k = int(math.isqrt(p["pw"].shape[0] // cin))
    xb = x.astype(ACT_DTYPE)
    if k == 1:
        feat = xb
    else:
        xp = jnp.pad(xb.reshape(n, H, W, cin), ((0, 0), (1, 1), (1, 1), (0, 0)))
        feat = jnp.concatenate(
            [xp[:, dy:dy + H, dx:dx + W, :].reshape(n, HW, cin)
             for dy in range(3) for dx in range(3)], axis=-1)
    y1 = jnp.einsum("nsc,cd->nsd", feat, p["pw"],
                    preferred_element_type=jnp.float32)
    y1 = jnp.clip(y1 + p["pb"], 0.0, 6.0)
    c = y1.shape[-1]
    yp = jnp.pad(y1.reshape(n, H, W, c), ((0, 0), (1, 1), (1, 1), (0, 0)))
    acc = jnp.zeros((n, H, W, c), jnp.float32)
    for t in range(9):
        dy, dx = divmod(t, 3)
        acc = acc + yp[:, dy:dy + H, dx:dx + W, :] * p["dw"][t]
    y2 = jnp.clip(acc + p["db"], 0.0, 6.0).reshape(n, HW, c)
    return jnp.concatenate([y1, y2], axis=-1)


def _ref_ghost_conv(x, hw, p, skip=None, out_dtype=ACT_DTYPE):
    out = _ref_ghost_core(x.astype(ACT_DTYPE), hw, p)
    if skip is not None:
        out = out + skip.astype(ACT_DTYPE).astype(jnp.float32)
    return out.astype(out_dtype)


def _ref_dw_conv(x, hw, p, skip=None, out_dtype=ACT_DTYPE):
    H, W = hw
    n, HW, C = x.shape
    k = int(math.isqrt(p["w"].shape[0]))
    pad = k // 2
    xf = x.astype(ACT_DTYPE).astype(jnp.float32).reshape(n, H, W, C)
    xp = jnp.pad(xf, ((0, 0), (pad, pad), (pad, pad), (0, 0)))
    acc = jnp.zeros((n, H, W, C), jnp.float32)
    for t in range(k * k):
        dy, dx = divmod(t, k)
        acc = acc + xp[:, dy:dy + H, dx:dx + W, :] * p["w"][t]
    y = jnp.clip(acc + p["b"], 0.0, 6.0).reshape(n, HW, C)
    if skip is not None:
        y = y + skip.astype(ACT_DTYPE).astype(jnp.float32)
    return y.astype(out_dtype)


def _ref_csp_block(x, hw, p, out_dtype=ACT_DTYPE):
    xb = x.astype(ACT_DTYPE)
    a = _ref_ghost_core(xb, hw, p["cv1"])
    for mp in p["m"]:
        a = _ref_ghost_core(a, hw, mp)
    b = _ref_ghost_core(xb, hw, p["cv2"])
    out = _ref_ghost_core(jnp.concatenate([a, b], axis=-1), hw, p["cv3"])
    return out.astype(out_dtype)


def _ref_csppan_forward(c3, c4, c5, params, hw3):
    H3, W3 = hw3
    hw4 = (H3 // 2, W3 // 2)
    hw5 = (H3 // 4, W3 // 4)
    x3, x4, x5 = _to_rows(c3), _to_rows(c4), _to_rows(c5)
    nk = params
    p5 = _ref_ghost_conv(x5, hw5, nk["reduce"][2])
    p4 = _ref_ghost_conv(x4, hw4, nk["reduce"][1], skip=upsample2(p5, hw5))
    p3 = _ref_ghost_conv(x3, hw3, nk["reduce"][0], skip=upsample2(p4, hw4))
    p3 = _ref_dw_conv(p3, hw3, nk["lat"][0])
    p4 = _ref_dw_conv(p4, hw4, nk["lat"][1], skip=maxpool2(p3, hw3))
    p5 = p5 + maxpool2(p4, hw4)
    o3 = _ref_csp_block(p3, hw3, nk["out"][0], out_dtype=jnp.float32)
    o4 = _ref_csp_block(p4, hw4, nk["out"][1], out_dtype=jnp.float32)
    o5 = _ref_csp_block(p5, hw5, nk["out"][2], out_dtype=jnp.float32)
    return _to_nchw(o3, hw3), _to_nchw(o4, hw4), _to_nchw(o5, hw5)


# ----------------------------------- main --------------------------------------

if __name__ == "__main__":
    N = 2
    IN_CHS = (32, 64, 128)      # small synthetic backbone channels
    OUT_CH = 128                # lane-dense neck width (128 lanes)
    H3 = W3 = 32                # finest level; W stays a multiple of 8 at every level
    ATOL = RTOL = 3e-2

    root = jax.random.PRNGKey(0)
    kp, k3, k4, k5, ku = jax.random.split(root, 5)
    params = build_csppan_params(kp, IN_CHS, OUT_CH)

    c3 = jax.random.normal(k3, (N, IN_CHS[0], H3, W3), jnp.float32)
    c4 = jax.random.normal(k4, (N, IN_CHS[1], H3 // 2, W3 // 2), jnp.float32)
    c5 = jax.random.normal(k5, (N, IN_CHS[2], H3 // 4, W3 // 4), jnp.float32)

    hw3 = (H3, W3)
    hw4 = (H3 // 2, W3 // 2)
    hw5 = (H3 // 4, W3 // 4)
    kg = KeyGen(ku)

    # --- unit checks of each fused kernel vs the pure-JAX reference ------------
    xg = jax.random.normal(kg(), (N, hw4[0] * hw4[1], 64), jnp.float32).astype(ACT_DTYPE)
    sg = jax.random.normal(kg(), (N, hw4[0] * hw4[1], OUT_CH), jnp.float32).astype(ACT_DTYPE)
    gp = params["reduce"][1]
    got = ghost_conv(xg, hw4, gp, skip=sg, out_dtype=jnp.float32)
    want = _ref_ghost_conv(xg, hw4, gp, skip=sg, out_dtype=jnp.float32)
    assert bool(jnp.allclose(got, want, atol=ATOL, rtol=RTOL))

    xd = jax.random.normal(kg(), (N, H3 * W3, OUT_CH), jnp.float32).astype(ACT_DTYPE)
    sd = jax.random.normal(kg(), (N, H3 * W3, OUT_CH), jnp.float32).astype(ACT_DTYPE)
    dp = params["lat"][0]
    got = dw_conv(xd, hw3, dp, skip=sd, out_dtype=jnp.float32)
    want = _ref_dw_conv(xd, hw3, dp, skip=sd, out_dtype=jnp.float32)
    assert bool(jnp.allclose(got, want, atol=ATOL, rtol=RTOL))

    for hw_t, n_csp, mk in ((hw4, 1, 1), (hw5, 2, 3)):
        cp = make_csp_params(KeyGen(kg()), OUT_CH, n=n_csp, m_k=mk, zero_bn_cv3=False)
        xc = jax.random.normal(kg(), (N, hw_t[0] * hw_t[1], OUT_CH),
                               jnp.float32).astype(ACT_DTYPE)
        got = csp_block(xc, hw_t, cp, out_dtype=jnp.float32)
        want = _ref_csp_block(xc, hw_t, cp, out_dtype=jnp.float32)
        assert bool(jnp.allclose(got, want, atol=ATOL, rtol=RTOL))

    # --- full forward (faithful zero-init cv3 BN, as in the torch module) ------
    fwd = jax.jit(functools.partial(csppan_forward, hw3=hw3))
    p3, p4, p5 = fwd(c3, c4, c5, params)
    jax.block_until_ready((p3, p4, p5))

    r3, r4, r5 = _ref_csppan_forward(c3, c4, c5, params, hw3)

    assert p3.shape == (N, OUT_CH, H3, W3)
    assert p4.shape == (N, OUT_CH, H3 // 2, W3 // 2)
    assert p5.shape == (N, OUT_CH, H3 // 4, W3 // 4)
    for got, want in ((p3, r3), (p4, r4), (p5, r5)):
        assert bool(jnp.all(jnp.isfinite(got)))
        assert bool(jnp.all((got >= 0.0) & (got <= 6.0)))    # ReLU6-bounded outputs
        assert bool(jnp.allclose(got, want, atol=ATOL, rtol=RTOL))

    print("KERNEL_OK")
</pallas_src>

<mosaic_0001>
module attributes {stable_mosaic.version = 11 : i64} {
  func.func @_ghost_kernel(%arg0: i32, %arg1: memref<1x256x64xbf16, #tpu.memory_space<vmem>>, %arg2: memref<64x64xbf16, #tpu.memory_space<vmem>>, %arg3: memref<1x64xf32, #tpu.memory_space<vmem>>, %arg4: memref<9x1x1x64xf32, #tpu.memory_space<vmem>>, %arg5: memref<1x1x64xf32, #tpu.memory_space<vmem>>, %arg6: memref<1x256x128xbf16, #tpu.memory_space<vmem>>, %arg7: memref<1x256x128xf32, #tpu.memory_space<vmem>>, %arg8: memref<18x18x64xf32, #tpu.memory_space<vmem>>) attributes {dimension_semantics = [#tpu.dimension_semantics<parallel>], iteration_bounds = array<i64: 2>, scalar_prefetch = 0 : i64, scratch_operands = 1 : i64, tpu.core_type = #tpu.core_type<tc>, window_params = [{transform_indices = @transform_0, window_bounds = array<i64: 1, 256, 64>}, {pipeline_mode = #tpu.pipeline_mode<synchronous>, transform_indices = @transform_1, window_bounds = array<i64: 64, 64>}, {pipeline_mode = #tpu.pipeline_mode<synchronous>, transform_indices = @transform_2, window_bounds = array<i64: 1, 64>}, {pipeline_mode = #tpu.pipeline_mode<synchronous>, transform_indices = @transform_3, window_bounds = array<i64: 9, 1, 1, 64>}, {pipeline_mode = #tpu.pipeline_mode<synchronous>, transform_indices = @transform_4, window_bounds = array<i64: 1, 1, 64>}, {transform_indices = @transform_5, window_bounds = array<i64: 1, 256, 128>}, {transform_indices = @transform_6, window_bounds = array<i64: 1, 256, 128>}]} {
    %cst = arith.constant 0.000000e+00 : f32
    %0 = vector.broadcast %cst : f32 to vector<1x18x64xf32>
    %c0 = arith.constant 0 : index
    %c0_0 = arith.constant 0 : index
    %c0_1 = arith.constant 0 : index
    %1 = vector.load %arg8[%c0, %c0_0, %c0_1] : memref<18x18x64xf32, #tpu.memory_space<vmem>>, vector<1x18x64xf32>
    tpu.vector_store %arg8[%c0, %c0_0, %c0_1], %0 {strides = array<i32>} : memref<18x18x64xf32, #tpu.memory_space<vmem>>, vector<1x18x64xf32>,
    %cst_2 = arith.constant 0.000000e+00 : f32
    %2 = vector.broadcast %cst_2 : f32 to vector<1x18x64xf32>
    %c17 = arith.constant 17 : index
    %c0_3 = arith.constant 0 : index
    %c0_4 = arith.constant 0 : index
    %3 = vector.load %arg8[%c17, %c0_3, %c0_4] : memref<18x18x64xf32, #tpu.memory_space<vmem>>, vector<1x18x64xf32>
    tpu.vector_store %arg8[%c17, %c0_3, %c0_4], %2 {strides = array<i32>} : memref<18x18x64xf32, #tpu.memory_space<vmem>>, vector<1x18x64xf32>,
    %cst_5 = arith.constant 0.000000e+00 : f32
    %4 = vector.broadcast %cst_5 : f32 to vector<16x1x64xf32>
    %c1 = arith.constant 1 : index
    %c0_6 = arith.constant 0 : index
    %c0_7 = arith.constant 0 : index
    %5 = vector.load %arg8[%c1, %c0_6, %c0_7] : memref<18x18x64xf32, #tpu.memory_space<vmem>>, vector<16x1x64xf32>
    tpu.vector_store %arg8[%c1, %c0_6, %c0_7], %4 {strides = array<i32>} : memref<18x18x64xf32, #tpu.memory_space<vmem>>, vector<16x1x64xf32>,
    %cst_8 = arith.constant 0.000000e+00 : f32
    %6 = vector.broadcast %cst_8 : f32 to vector<16x1x64xf32>
    %c1_9 = arith.constant 1 : index
    %c17_10 = arith.constant 17 : index
    %c0_11 = arith.constant 0 : index
    %7 = vector.load %arg8[%c1_9, %c17_10, %c0_11] : memref<18x18x64xf32, #tpu.memory_space<vmem>>, vector<16x1x64xf32>
    tpu.vector_store %arg8[%c1_9, %c17_10, %c0_11], %6 {strides = array<i32>} : memref<18x18x64xf32, #tpu.memory_space<vmem>>, vector<16x1x64xf32>,
    %c0_12 = arith.constant 0 : index
    %c0_13 = arith.constant 0 : index
    %c0_14 = arith.constant 0 : index
    %8 = vector.load %arg1[%c0_12, %c0_13, %c0_14] : memref<1x256x64xbf16, #tpu.memory_space<vmem>>, vector<1x256x64xbf16>
    %9 = vector.shape_cast %8 : vector<1x256x64xbf16> to vector<256x64xbf16>
    %c0_15 = arith.constant 0 : index
    %c0_16 = arith.constant 0 : index
    %10 = vector.load %arg2[%c0_15, %c0_16] : memref<64x64xbf16, #tpu.memory_space<vmem>>, vector<64x64xbf16>
    %cst_17 = arith.constant dense<0.000000e+00> : vector<256x64xf32>
    %11 = tpu.matmul %9, %10, %cst_17 {dimension_numbers = #tpu.dot_dimension_numbers<[1], [0], [0], [1], [0, 0, 1, 1], [], []>} : vector<256x64xbf16>, vector<64x64xbf16>, vector<256x64xf32> -> vector<256x64xf32>
    %c0_18 = arith.constant 0 : index
    %c0_19 = arith.constant 0 : index
    %12 = vector.load %arg3[%c0_18, %c0_19] : memref<1x64xf32, #tpu.memory_space<vmem>>, vector<1x64xf32>
    %13 = vector.broadcast %12 : vector<1x64xf32> to vector<256x64xf32>
    %14 = arith.addf %11, %13 : vector<256x64xf32>
    %cst_20 = arith.constant 0.000000e+00 : f32
    %cst_21 = arith.constant 6.000000e+00 : f32
    %15 = vector.broadcast %cst_20 : f32 to vector<256x64xf32>
    %16 = arith.maximumf %15, %14 : vector<256x64xf32>
    %17 = vector.broadcast %cst_21 : f32 to vector<256x64xf32>
    %18 = arith.minimumf %17, %16 : vector<256x64xf32>
    %19 = vector.shape_cast %18 : vector<256x64xf32> to vector<16x16x64xf32>
    %c1_22 = arith.constant 1 : index
    %c1_23 = arith.constant 1 : index
    %c0_24 = arith.constant 0 : index
    %20 = vector.load %arg8[%c1_22, %c1_23, %c0_24] : memref<18x18x64xf32, #tpu.memory_space<vmem>>, vector<16x16x64xf32>
    tpu.vector_store %arg8[%c1_22, %c1_23, %c0_24], %19 {strides = array<i32>} : memref<18x18x64xf32, #tpu.memory_space<vmem>>, vector<16x16x64xf32>,
    %c0_25 = arith.constant 0 : index
    %c0_26 = arith.constant 0 : index
    %c0_27 = arith.constant 0 : index
    %21 = vector.load %arg8[%c0_25, %c0_26, %c0_27] : memref<18x18x64xf32, #tpu.memory_space<vmem>>, vector<16x16x64xf32>
    %c0_28 = arith.constant 0 : index
    %c0_29 = arith.constant 0 : index
    %c0_30 = arith.constant 0 : index
    %c0_31 = arith.constant 0 : index
    %22 = vector.load %arg4[%c0_28, %c0_29, %c0_30, %c0_31] : memref<9x1x1x64xf32, #tpu.memory_space<vmem>>, vector<1x1x1x64xf32>
    %23 = vector.shape_cast %22 : vector<1x1x1x64xf32> to vector<1x1x64xf32>
    %24 = vector.broadcast %23 : vector<1x1x64xf32> to vector<16x16x64xf32>
    %25 = arith.mulf %21, %24 : vector<16x16x64xf32>
    %c0_32 = arith.constant 0 : index
    %c1_33 = arith.constant 1 : index
    %c0_34 = arith.constant 0 : index
    %26 = vector.load %arg8[%c0_32, %c1_33, %c0_34] : memref<18x18x64xf32, #tpu.memory_space<vmem>>, vector<16x16x64xf32>
    %c1_35 = arith.constant 1 : index
    %c0_36 = arith.constant 0 : index
    %c0_37 = arith.constant 0 : index
    %c0_38 = arith.constant 0 : index
    %27 = vector.load %arg4[%c1_35, %c0_36, %c0_37, %c0_38] : memref<9x1x1x64xf32, #tpu.memory_space<vmem>>, vector<1x1x1x64xf32>
    %28 = vector.shape_cast %27 : vector<1x1x1x64xf32> to vector<1x1x64xf32>
    %29 = vector.broadcast %28 : vector<1x1x64xf32> to vector<16x16x64xf32>
    %30 = arith.mulf %26, %29 : vector<16x16x64xf32>
    %31 = arith.addf %25, %30 : vector<16x16x64xf32>
    %c0_39 = arith.constant 0 : index
    %c2 = arith.constant 2 : index
    %c0_40 = arith.constant 0 : index
    %32 = vector.load %arg8[%c0_39, %c2, %c0_40] : memref<18x18x64xf32, #tpu.memory_space<vmem>>, vector<16x16x64xf32>
    %c2_41 = arith.constant 2 : index
    %c0_42 = arith.constant 0 : index
    %c0_43 = arith.constant 0 : index
    %c0_44 = arith.constant 0 : index
    %33 = vector.load %arg4[%c2_41, %c0_42, %c0_43, %c0_44] : memref<9x1x1x64xf32, #tpu.memory_space<vmem>>, vector<1x1x1x64xf32>
    %34 = vector.shape_cast %33 : vector<1x1x1x64xf32> to vector<1x1x64xf32>
    %35 = vector.broadcast %34 : vector<1x1x64xf32> to vector<16x16x64xf32>
    %36 = arith.mulf %32, %35 : vector<16x16x64xf32>
    %37 = arith.addf %31, %36 : vector<16x16x64xf32>
    %c1_45 = arith.constant 1 : index
    %c0_46 = arith.constant 0 : index
    %c0_47 = arith.constant 0 : index
    %38 = vector.load %arg8[%c1_45, %c0_46, %c0_47] : memref<18x18x64xf32, #tpu.memory_space<vmem>>, vector<16x16x64xf32>
    %c3 = arith.constant 3 : index
    %c0_48 = arith.constant 0 : index
    %c0_49 = arith.constant 0 : index
    %c0_50 = arith.constant 0 : index
    %39 = vector.load %arg4[%c3, %c0_48, %c0_49, %c0_50] : memref<9x1x1x64xf32, #tpu.memory_space<vmem>>, vector<1x1x1x64xf32>
    %40 = vector.shape_cast %39 : vector<1x1x1x64xf32> to vector<1x1x64xf32>
    %41 = vector.broadcast %40 : vector<1x1x64xf32> to vector<16x16x64xf32>
    %42 = arith.mulf %38, %41 : vector<16x16x64xf32>
    %43 = arith.addf %37, %42 : vector<16x16x64xf32>
    %c1_51 = arith.constant 1 : index
    %c1_52 = arith.constant 1 : index
    %c0_53 = arith.constant 0 : index
    %44 = vector.load %arg8[%c1_51, %c1_52, %c0_53] : memref<18x18x64xf32, #tpu.memory_space<vmem>>, vector<16x16x64xf32>
    %c4 = arith.constant 4 : index
    %c0_54 = arith.constant 0 : index
    %c0_55 = arith.constant 0 : index
    %c0_56 = arith.constant 0 : index
    %45 = vector.load %arg4[%c4, %c0_54, %c0_55, %c0_56] : memref<9x1x1x64xf32, #tpu.memory_space<vmem>>, vector<1x1x1x64xf32>
    %46 = vector.shape_cast %45 : vector<1x1x1x64xf32> to vector<1x1x64xf32>
    %47 = vector.broadcast %46 : vector<1x1x64xf32> to vector<16x16x64xf32>
    %48 = arith.mulf %44, %47 : vector<16x16x64xf32>
    %49 = arith.addf %43, %48 : vector<16x16x64xf32>
    %c1_57 = arith.constant 1 : index
    %c2_58 = arith.constant 2 : index
    %c0_59 = arith.constant 0 : index
    %50 = vector.load %arg8[%c1_57, %c2_58, %c0_59] : memref<18x18x64xf32, #tpu.memory_space<vmem>>, vector<16x16x64xf32>
    %c5 = arith.constant 5 : index
    %c0_60 = arith.constant 0 : index
    %c0_61 = arith.constant 0 : index
    %c0_62 = arith.constant 0 : index
    %51 = vector.load %arg4[%c5, %c0_60, %c0_61, %c0_62] : memref<9x1x1x64xf32, #tpu.memory_space<vmem>>, vector<1x1x1x64xf32>
    %52 = vector.shape_cast %51 : vector<1x1x1x64xf32> to vector<1x1x64xf32>
    %53 = vector.broadcast %52 : vector<1x1x64xf32> to vector<16x16x64xf32>
    %54 = arith.mulf %50, %53 : vector<16x16x64xf32>
    %55 = arith.addf %49, %54 : vector<16x16x64xf32>
    %c2_63 = arith.constant 2 : index
    %c0_64 = arith.constant 0 : index
    %c0_65 = arith.constant 0 : index
    %56 = vector.load %arg8[%c2_63, %c0_64, %c0_65] : memref<18x18x64xf32, #tpu.memory_space<vmem>>, vector<16x16x64xf32>
    %c6 = arith.constant 6 : index
    %c0_66 = arith.constant 0 : index
    %c0_67 = arith.constant 0 : index
    %c0_68 = arith.constant 0 : index
    %57 = vector.load %arg4[%c6, %c0_66, %c0_67, %c0_68] : memref<9x1x1x64xf32, #tpu.memory_space<vmem>>, vector<1x1x1x64xf32>
    %58 = vector.shape_cast %57 : vector<1x1x1x64xf32> to vector<1x1x64xf32>
    %59 = vector.broadcast %58 : vector<1x1x64xf32> to vector<16x16x64xf32>
    %60 = arith.mulf %56, %59 : vector<16x16x64xf32>
    %61 = arith.addf %55, %60 : vector<16x16x64xf32>
    %c2_69 = arith.constant 2 : index
    %c1_70 = arith.constant 1 : index
    %c0_71 = arith.constant 0 : index
    %62 = vector.load %arg8[%c2_69, %c1_70, %c0_71] : memref<18x18x64xf32, #tpu.memory_space<vmem>>, vector<16x16x64xf32>
    %c7 = arith.constant 7 : index
    %c0_72 = arith.constant 0 : index
    %c0_73 = arith.constant 0 : index
    %c0_74 = arith.constant 0 : index
    %63 = vector.load %arg4[%c7, %c0_72, %c0_73, %c0_74] : memref<9x1x1x64xf32, #tpu.memory_space<vmem>>, vector<1x1x1x64xf32>
    %64 = vector.shape_cast %63 : vector<1x1x1x64xf32> to vector<1x1x64xf32>
    %65 = vector.broadcast %64 : vector<1x1x64xf32> to vector<16x16x64xf32>
    %66 = arith.mulf %62, %65 : vector<16x16x64xf32>
    %67 = arith.addf %61, %66 : vector<16x16x64xf32>
    %c2_75 = arith.constant 2 : index
    %c2_76 = arith.constant 2 : index
    %c0_77 = arith.constant 0 : index
    %68 = vector.load %arg8[%c2_75, %c2_76, %c0_77] : memref<18x18x64xf32, #tpu.memory_space<vmem>>, vector<16x16x64xf32>
    %c8 = arith.constant 8 : index
    %c0_78 = arith.constant 0 : index
    %c0_79 = arith.constant 0 : index
    %c0_80 = arith.constant 0 : index
    %69 = vector.load %arg4[%c8, %c0_78, %c0_79, %c0_80] : memref<9x1x1x64xf32, #tpu.memory_space<vmem>>, vector<1x1x1x64xf32>
    %70 = vector.shape_cast %69 : vector<1x1x1x64xf32> to vector<1x1x64xf32>
    %71 = vector.broadcast %70 : vector<1x1x64xf32> to vector<16x16x64xf32>
    %72 = arith.mulf %68, %71 : vector<16x16x64xf32>
    %73 = arith.addf %67, %72 : vector<16x16x64xf32>
    %c0_81 = arith.constant 0 : index
    %c0_82 = arith.constant 0 : index
    %c0_83 = arith.constant 0 : index
    %74 = vector.load %arg5[%c0_81, %c0_82, %c0_83] : memref<1x1x64xf32, #tpu.memory_space<vmem>>, vector<1x1x64xf32>
    %75 = vector.broadcast %74 : vector<1x1x64xf32> to vector<16x16x64xf32>
    %76 = arith.addf %73, %75 : vector<16x16x64xf32>
    %cst_84 = arith.constant 0.000000e+00 : f32
    %cst_85 = arith.constant 6.000000e+00 : f32
    %77 = vector.broadcast %cst_84 : f32 to vector<16x16x64xf32>
    %78 = arith.maximumf %77, %76 : vector<16x16x64xf32>
    %79 = vector.broadcast %cst_85 : f32 to vector<16x16x64xf32>
    %80 = arith.minimumf %79, %78 : vector<16x16x64xf32>
    %81 = vector.shape_cast %80 : vector<16x16x64xf32> to vector<256x64xf32>
    %82 = tpu.concatenate %18, %81 in 1 : vector<256x64xf32>, vector<256x64xf32> -> vector<256x128xf32>
    %c0_86 = arith.constant 0 : index
    %c0_87 = arith.constant 0 : index
    %c0_88 = arith.constant 0 : index
    %83 = vector.load %arg6[%c0_86, %c0_87, %c0_88] : memref<1x256x128xbf16, #tpu.memory_space<vmem>>, vector<1x256x128xbf16>
    %84 = vector.shape_cast %83 : vector<1x256x128xbf16> to vector<256x128xbf16>
    %85 = arith.extf %84 : vector<256x128xbf16> to vector<256x128xf32>
    %86 = arith.addf %82, %85 : vector<256x128xf32>
    %c0_89 = arith.constant 0 : index
    %c0_90 = arith.constant 0 : index
    %c0_91 = arith.constant 0 : index
    %87 = vector.load %arg7[%c0_89, %c0_90, %c0_91] : memref<1x256x128xf32, #tpu.memory_space<vmem>>, vector<1x256x128xf32>
    %88 = vector.shape_cast %87 : vector<1x256x128xf32> to vector<256x128xf32>
    %89 = vector.shape_cast %86 : vector<256x128xf32> to vector<1x256x128xf32>
    tpu.vector_store %arg7[%c0_89, %c0_90, %c0_91], %89 {strides = array<i32>} : memref<1x256x128xf32, #tpu.memory_space<vmem>>, vector<1x256x128xf32>,
    return
  }
  func.func @transform_0(%arg0: i32) -> (i32, i32, i32) {
    %c0_i32 = arith.constant 0 : i32
    %c0_i32_0 = arith.constant 0 : i32
    %c0_i32_1 = arith.constant 0 : i32
    return %arg0, %c0_i32, %c0_i32_0 : i32, i32, i32
  }
  func.func @transform_1(%arg0: i32) -> (i32, i32) {
    %c0_i32 = arith.constant 0 : i32
    %c0_i32_0 = arith.constant 0 : i32
    %c0_i32_1 = arith.constant 0 : i32
    return %c0_i32, %c0_i32_0 : i32, i32
  }
  func.func @transform_2(%arg0: i32) -> (i32, i32) {
    %c0_i32 = arith.constant 0 : i32
    %c0_i32_0 = arith.constant 0 : i32
    %c0_i32_1 = arith.constant 0 : i32
    return %c0_i32, %c0_i32_0 : i32, i32
  }
  func.func @transform_3(%arg0: i32) -> (i32, i32, i32, i32) {
    %c0_i32 = arith.constant 0 : i32
    %c0_i32_0 = arith.constant 0 : i32
    %c0_i32_1 = arith.constant 0 : i32
    %c0_i32_2 = arith.constant 0 : i32
    %c0_i32_3 = arith.constant 0 : i32
    return %c0_i32, %c0_i32_0, %c0_i32_1, %c0_i32_2 : i32, i32, i32, i32
  }
  func.func @transform_4(%arg0: i32) -> (i32, i32, i32) {
    %c0_i32 = arith.constant 0 : i32
    %c0_i32_0 = arith.constant 0 : i32
    %c0_i32_1 = arith.constant 0 : i32
    %c0_i32_2 = arith.constant 0 : i32
    return %c0_i32, %c0_i32_0, %c0_i32_1 : i32, i32, i32
  }
  func.func @transform_5(%arg0: i32) -> (i32, i32, i32) {
    %c0_i32 = arith.constant 0 : i32
    %c0_i32_0 = arith.constant 0 : i32
    %c0_i32_1 = arith.constant 0 : i32
    return %arg0, %c0_i32, %c0_i32_0 : i32, i32, i32
  }
  func.func @transform_6(%arg0: i32) -> (i32, i32, i32) {
    %c0_i32 = arith.constant 0 : i32
    %c0_i32_0 = arith.constant 0 : i32
    %c0_i32_1 = arith.constant 0 : i32
    return %arg0, %c0_i32, %c0_i32_0 : i32, i32, i32
  }
}

</mosaic_0001>

<bundles_post_ra>
// kernel: tpu_custom_call.1
= control target key start
LH: loop header
LB: loop body
LE: loop exit
PB: predicated region body
PF: predicated region fallthrough
CT: control target
= control target key end

     0   :  { %11 = vsyncpa [#allocation4], 0  ;;  %s3962_s0 = inlined_call_operand.vmem [shape: bf16[2,256,64], index: 0, kind: input, shape index: {}]   ;;  %s3963_s1 = inlined_call_operand.vmem [shape: bf16[64,64], index: 1, kind: input, shape index: {}]   ;;  %s3964_s2 = inlined_call_operand.vmem [shape: f32[1,64], index: 2, kind: input, shape index: {}]   ;;  %s3965_s3 = inlined_call_operand.vmem [shape: f32[9,1,1,64], index: 3, kind: input, shape index: {}]   ;;  %s3966_s4 = inlined_call_operand.vmem [shape: f32[1,1,64], index: 4, kind: input, shape index: {}]   ;;  %s3967_s5 = inlined_call_operand.vmem [shape: bf16[2,256,128], index: 5, kind: input, shape index: {}]   ;;  %s3968_s6 = inlined_call_operand.hbm [shape: f32[2,256,128], index: 6, kind: output, shape index: {}]  }
   0x1   :  { %13 = vsyncpa [#allocation4 + $0x1], 0  ;;  %s2547_s21 = smov 0   ;;  %s2549_s22 = smov 0  }
   0x2   :  { %s2551_s23 = smov 0   ;;  %s2553_s24 = smov 0  }
   0x3 LB: > { %s2568_s25 = sadd.s32 4294967295, %s2505_s24   ;;  %s2153_s26 = sadd.s32 4294967294, %s2505_s24   ;;  %s2505_s24 = sphi %s2553_s24, %s4079_s24   ;;  %s2501_s23 = sphi %s2551_s23, %s4078_s23   ;;  %s2497_s22 = sphi %s2549_s22, %s4077_s22   ;;  %s2493_s21 = sphi %s2547_s21, %s4076_s21  }
   0x4   : > { %s2572_s27 = sadd.s32 1, %s2505_s24   ;;  %s162_s28 = sadd.s32 1, %s2501_s23 }
   0x5   : > { %s159_s29 = ssub.s32 %s2505_s24, %s2572_s27  ;;  %p172_p0 = scmp.ne.s32.totalorder %s2501_s23, %s2497_s22 }
   0x6   : > { %p160_p1 = scmp.eq.s32.totalorder %s159_s29, 0  ;;  %p173_p2 = scmp.eq.s32.totalorder %s2568_s25, 1 }
   0x7   : > { %p178_p3 = scmp.ne.s32.totalorder %s2497_s22, %s2493_s21  ;;  %p179_p4 = scmp.eq.s32.totalorder %s2153_s26, 1 }
   0x8   : > { %s2583_s30 = scalar_select %p160_p1, %s2501_s23, %s162_s28  }
   0x9   : > { %p2585_p5 = por %p173_p2, %p172_p0  ;;  %p2589_p6 = por %p179_p4, %p178_p3 }
   0xa   : > { %p2156_p7 = scmp.ge.s32.totalorder %s2505_s24, 1  ;;  %p225_p8 = scmp.lt.s32.totalorder %s2505_s24, 3 }
   0xc   : > { %p226_p9 = pnand %p2156_p7, %p225_p8 }
   0xe   : > { %229 = sbr.rel (%p226_p9) target bundleno = 562 (0x232), region = 44 }
  0x13   : > { %v2415_v0 = vld [vmem:[%s3963_s1 + $0x18] sm:$0xff]   ;;  %p260_p10 = scmp.lt.s32.totalorder %s2568_s25, 1  ;;  %v2416_v1 = vld [vmem:[%s3963_s1 + $0x10] sm:$0xff]   ;;  %v2417_v2 = vld [vmem:[%s3963_s1 + $0x8] sm:$0xff]   ;;  %vm271_vm0 = vcmask 523264   ;;  %v2507_v20 = vmov 0.0  }
  0x14   : > { %2324 = vmatprep.subr.bf16.mxu0 %v2415_v0  ;;  %2364 = vmatprep.subr.bf16.mxu1 %v2415_v0  ;;  %v2418_v5 = vld [vmem:[%s3963_s1] sm:$0xff]   ;;  %272 = vst.msk [vmem:[#allocation2] sm:$0xff] %vm271_vm0, %v2507_v20  ;;  %273 = vst.msk [vmem:[#allocation2 + $0x8] sm:$0xff] %vm271_vm0, %v2507_v20  ;;  %vm281_vm1 = vcmask 516096   ;;  %vm274_vm2 = vcmask 517120   ;;  %s2508_s18 = smov 64  }
  0x15   : > { %s2603_s13 = scalar_select %p260_p10, %s2568_s25, 1  ;;  %2325 = vmatpush3.bf16.msra.mxu0 %v2415_v0  ;;  %2368 = vmatpush3.bf16.msra.mxu1 %v2415_v0  ;;  %277 = vst.msk [vmem:[#allocation2 + $0x198] sm:$0xff] %vm271_vm0, %v2507_v20  ;;  %278 = vst.msk [vmem:[#allocation2 + $0x1a0] sm:$0xff] %vm271_vm0, %v2507_v20  ;;  %v2690_v21 = vld [vmem:[%s3964_s2] ss:$0 sm:$0xff] }
  0x16   : > { %2326 = vmatprep.subr.bf16.mxu0 %v2416_v1  ;;  %2365 = vmatprep.subr.bf16.mxu1 %v2416_v1  ;;  %282 = vst.msk [vmem:[#allocation2 + $0x18] sm:$0x1] %vm281_vm1, %v2507_v20  ;;  %283 = vst.msk [vmem:[#allocation2 + $0x30] sm:$0x1] %vm281_vm1, %v2507_v20  ;;  %v2697_v27 = vld [vmem:[%s3965_s3] ss:$0 sm:$0xff] }
  0x17   : > { %s2222_s16 = sshll.u32 %s2603_s13, 7  ;;  %284 = vst.msk [vmem:[#allocation2 + $0x48] sm:$0x1] %vm281_vm1, %v2507_v20  ;;  %285 = vst.msk [vmem:[#allocation2 + $0x60] sm:$0x1] %vm281_vm1, %v2507_v20  ;;  %s257_s17 = sand.u32 1, %s2497_s22  }
  0x18   : > { %s2614_s19 = scalar_lea.vmem %s3962_s0, %s2222_s16  ;;  %286 = vst.msk [vmem:[#allocation2 + $0x78] sm:$0x1] %vm281_vm1, %v2507_v20  ;;  %287 = vst.msk [vmem:[#allocation2 + $0x90] sm:$0x1] %vm281_vm1, %v2507_v20  ;;  %v2702_v29 = vld [vmem:[%s3965_s3 + $0x1] ss:$0 sm:$0xff]  ;;  %s3766_s15 = scalar_lea.vmem %s3967_s5, %s2222_s16 }
  0x19   : > { %v2419_v3 = vld [vmem:[%s2614_s19] sm:$0xff]   ;;  %2327 = vmatpush3.bf16.msra.mxu0 %v2416_v1  ;;  %2369 = vmatpush3.bf16.msra.mxu1 %v2416_v1  ;;  %v2421_v6 = vld [vmem:[%s2614_s19 + $0x8] sm:$0xff]   ;;  %v2423_v8 = vld [vmem:[%s2614_s19 + $0x10] sm:$0xff]   ;;  %288 = vst.msk [vmem:[#allocation2 + $0xa8] sm:$0x1] %vm281_vm1, %v2507_v20  ;;  %s2157_s13 = sshll.u32 %s257_s17, 8 }
  0x1a   : > { %v2420_v4 = vld [vmem:[%s2614_s19 + $0x40] sm:$0xff]   ;;  %2328 = vmatprep.subr.bf16.mxu0 %v2417_v2  ;;  %2366 = vmatprep.subr.bf16.mxu1 %v2417_v2  ;;  %v2422_v7 = vld [vmem:[%s2614_s19 + $0x48] sm:$0xff]   ;;  %v2424_v9 = vld [vmem:[%s2614_s19 + $0x50] sm:$0xff]   ;;  %289 = vst.msk [vmem:[#allocation2 + $0xc0] sm:$0x1] %vm281_vm1, %v2507_v20  ;;  %s3801_s16 = scalar_lea.vmem [#allocation3], %s2157_s13 }
  0x1b   : > { %2332 = vmatprep.mubr.msk.bf16.mxu0 %vm271_vm0, %v2419_v3  ;;  %2348 = vmatprep.mubr.msk.bf16.mxu1 %vm271_vm0, %v2420_v4  ;;  %v2425_v10 = vld [vmem:[%s2614_s19 + $0x18] sm:$0xff]   ;;  %v2427_v12 = vld [vmem:[%s2614_s19 + $0x20] sm:$0xff]   ;;  %v2429_v14 = vld [vmem:[%s2614_s19 + $0x28] sm:$0xff]   ;;  %290 = vst.msk [vmem:[#allocation2 + $0xd8] sm:$0x1] %vm281_vm1, %v2507_v20  ;;  %s2509_s9 = smov [#allocation3]  }
  0x1c   : > { %v2426_v11 = vld [vmem:[%s2614_s19 + $0x58] sm:$0xff]   ;;  %v2428_v13 = vld [vmem:[%s2614_s19 + $0x60] sm:$0xff]   ;;  %v2430_v15 = vld [vmem:[%s2614_s19 + $0x68] sm:$0xff]   ;;  %291 = vst.msk [vmem:[#allocation2 + $0xf0] sm:$0x1] %vm281_vm1, %v2507_v20  ;;  %s2449_s10 = sshll.u32 %s2509_s9, 4  ;;  %s2450_s10 = int_to_ptr.vmem [resolvable:$false] %s2449_s10 }
  0x1d   : > { %2329 = vmatpush3.bf16.msra.mxu0 %v2417_v2  ;;  %2370 = vmatpush3.bf16.msra.mxu1 %v2417_v2  ;;  %v2431_v16 = vld [vmem:[%s2614_s19 + $0x30] sm:$0xff]   ;;  %v2432_v18 = vld [vmem:[%s2614_s19 + $0x38] sm:$0xff]   ;;  %292 = vst.msk [vmem:[#allocation2 + $0x108] sm:$0x1] %vm281_vm1, %v2507_v20  ;;  %293 = vst.msk [vmem:[#allocation2 + $0x120] sm:$0x1] %vm281_vm1, %v2507_v20 }
  0x1e   : > { %2330 = vmatprep.subr.bf16.mxu0 %v2418_v5  ;;  %2367 = vmatprep.subr.bf16.mxu1 %v2418_v5  ;;  %v2433_v17 = vld [vmem:[%s2614_s19 + $0x70] sm:$0xff]   ;;  %v2434_v19 = vld [vmem:[%s2614_s19 + $0x78] sm:$0xff]   ;;  %294 = vst.msk [vmem:[#allocation2 + $0x138] sm:$0x1] %vm281_vm1, %v2507_v20  ;;  %295 = vst.msk [vmem:[#allocation2 + $0x150] sm:$0x1] %vm281_vm1, %v2507_v20 }
  0x1f   : > { %296 = vst.msk [vmem:[#allocation2 + $0x168] sm:$0x1] %vm281_vm1, %v2507_v20  ;;  %297 = vst.msk [vmem:[#allocation2 + $0x180] sm:$0x1] %vm281_vm1, %v2507_v20  ;;  %v770_v24 = vld [vmem:[#allocation2] sm:$0xff]  ;;  %v771_v36 = vld [vmem:[#allocation2 + $0x8] sm:$0xff] }
  0x20   : > { %298 = vst.msk [vmem:[#allocation2 + $0x29] sm:$0x1] %vm281_vm1, %v2507_v20  ;;  %299 = vst.msk [vmem:[#allocation2 + $0x41] sm:$0x1] %vm281_vm1, %v2507_v20  ;;  %v841_v28 = vld [vmem:[#allocation2 + $0x1] sm:$0xff]  ;;  %v809_v40 = vmul.f32 %v2697_v27, %v770_v24  ;;  %v810_v52 = vmul.f32 %v2697_v27, %v771_v36  ;;  %s2079_s19 = sshll.u32 %s3801_s16, 4  ;;  %s3917_s19 = int_to_ptr.vmem [resolvable:$true] %s2079_s19 }
  0x21   : > { %2331 = vmatpush3.bf16.msra.mxu0 %v2418_v5  ;;  %2371 = vmatpush3.bf16.msra.mxu1 %v2418_v5  ;;  %300 = vst.msk [vmem:[#allocation2 + $0x59] sm:$0x1] %vm281_vm1, %v2507_v20  ;;  %301 = vst.msk [vmem:[#allocation2 + $0x71] sm:$0x1] %vm281_vm1, %v2507_v20  ;;  %v881_v41 = vmul.f32 %v2702_v29, %v841_v28  ;;  %v945_v42 = vld [vmem:[#allocation2 + $0x2] sm:$0xff]  ;;  %s2445_s29 = scalar_lea.vmem %s3917_s19, 4096  ;;  %p2452_p0 = scmp.lt.s32.totalorder %s3917_s19, %s2450_s10 }
  0x22   : > { %302 = vst.msk [vmem:[#allocation2 + $0x89] sm:$0x1] %vm281_vm1, %v2507_v20  ;;  %303 = vst.msk [vmem:[#allocation2 + $0xa1] sm:$0x1] %vm281_vm1, %v2507_v20  ;;  %v2715_v47 = vld [vmem:[%s3965_s3 + $0x2] ss:$0 sm:$0xff]  ;;  %p2446_p11 = scmp.ne.s32.totalorder %s3917_s19, %s2445_s29 }
  0x23   : > { %304 = vst.msk [vmem:[#allocation2 + $0xb9] sm:$0x1] %vm281_vm1, %v2507_v20  ;;  %305 = vst.msk [vmem:[#allocation2 + $0xd1] sm:$0x1] %vm281_vm1, %v2507_v20  ;;  %v913_v63 = vadd.f32 %v881_v41, %v809_v40  ;;  %v985_v0 = vmul.f32 %v2715_v47, %v945_v42  ;;  %v2766_v24 = vld [vmem:[%s3965_s3 + $0x6] ss:$0 sm:$0xff] }
  0x24   : > { %2333 = vmatmul.mubr.msk.bf16.vlgmr.msra.gmra.mxu0 %vm271_vm0, %v2421_v6  ;;  %2349 = vmatmul.mubr.msk.bf16.vlgmr.msra.gmra.mxu1 %vm271_vm0, %v2422_v7  ;;  %306 = vst.msk [vmem:[#allocation2 + $0xe9] sm:$0x1] %vm281_vm1, %v2507_v20  ;;  %307 = vst.msk [vmem:[#allocation2 + $0x101] sm:$0x1] %vm281_vm1, %v2507_v20  ;;  %v2788_v40 = vld [vmem:[%s3965_s3 + $0x3] ss:$0 sm:$0xff]  ;;  %p2447_p12 = pnand %p2446_p11, %p2585_p5 }
  0x25   : > { %2336 = vmatprep.mubr.msk.bf16.mxu0 %vm271_vm0, %v2423_v8  ;;  %2352 = vmatprep.mubr.msk.bf16.mxu1 %vm271_vm0, %v2424_v9  ;;  %308 = vst.msk [vmem:[#allocation2 + $0x119] sm:$0x1] %vm281_vm1, %v2507_v20  ;;  %309 = vst.msk [vmem:[#allocation2 + $0x131] sm:$0x1] %vm281_vm1, %v2507_v20  ;;  %s2451_s11 = scalar_lea.vmem %s2450_s10, 8192 }
  0x26   : > { %310 = vst.msk [vmem:[#allocation2 + $0x149] sm:$0x1] %vm281_vm1, %v2507_v20  ;;  %311 = vst.msk [vmem:[#allocation2 + $0x161] sm:$0x1] %vm281_vm1, %v2507_v20  ;;  %p2448_p13 = pneg %p2447_p12  ;;  %p2453_p1 = scmp.lt.s32.totalorder %s2451_s11, %s2445_s29 }
  0x27   : > { %312 = vst.msk [vmem:[#allocation2 + $0x179] sm:$0x1] %vm281_vm1, %v2507_v20  ;;  %313 = vst.msk [vmem:[#allocation2 + $0x191] sm:$0x1] %vm281_vm1, %v2507_v20 }
  0x28   : > { %275 = vst.msk [vmem:[#allocation2 + $0x10] sm:$0x3] %vm274_vm2, %v2507_v20  ;;  %279 = vst.msk [vmem:[#allocation2 + $0x1a8] sm:$0x3] %vm274_vm2, %v2507_v20  ;;  %p2454_p2 = por %p2453_p1, %p2452_p0 }
  0x2a   : > { %p2455_p3 = pnand %p2454_p2, %p2448_p13 }
  0x2c   : > { %2337 = vmatmul.mubr.msk.bf16.gmra.mxu0 %vm271_vm0, %v2425_v10  ;;  %2353 = vmatmul.mubr.msk.bf16.gmra.mxu1 %vm271_vm0, %v2426_v11 }
  0x2d   : > { %2340 = vmatprep.mubr.msk.bf16.mxu0 %vm271_vm0, %v2427_v12  ;;  %2356 = vmatprep.mubr.msk.bf16.mxu1 %vm271_vm0, %v2428_v13 }
  0x2f   : > { %v842_v37 = vld [vmem:[#allocation2 + $0x9] sm:$0xff] }
  0x30   : > { %v882_v53 = vmul.f32 %v2702_v29, %v842_v37  ;;  %v946_v58 = vld [vmem:[#allocation2 + $0xa] sm:$0xff] }
  0x31   : > { %v986_v10 = vmul.f32 %v2715_v47, %v946_v58 }
  0x32   : > { %v914_v9 = vadd.f32 %v882_v53, %v810_v52 }
  0x34   : > { %2341 = vmatmul.mubr.msk.bf16.gmra.mxu0 %vm271_vm0, %v2429_v14  ;;  %2357 = vmatmul.mubr.msk.bf16.gmra.mxu1 %vm271_vm0, %v2430_v15 }
  0x35   : > { %2344 = vmatprep.mubr.msk.bf16.mxu0 %vm271_vm0, %v2431_v16  ;;  %2360 = vmatprep.mubr.msk.bf16.mxu1 %vm271_vm0, %v2433_v17 }
  0x3c   : > { %2345 = vmatmul.mubr.msk.bf16.gmra.mxu0 %vm271_vm0, %v2432_v18  ;;  %2361 = vmatmul.mubr.msk.bf16.gmra.mxu1 %vm271_vm0, %v2434_v19 }
  0xe4   : > { %v2334_v22 = vpop.f32.mrf.mxu0  ;;  %v2350_v23 = vpop.f32.mrf.mxu1 }
  0xe5   : > { %v556_v25 = vadd.f32 %v2334_v22, %v2690_v21  ;;  %v620_v26 = vadd.f32 %v2350_v23, %v2690_v21 }
  0xe6   : > { %v547_v30 = vpop.f32.mrf.mxu0  ;;  %v611_v31 = vpop.f32.mrf.mxu1 }
  0xe7   : > { %v676_v32 = vmax.f32 %v556_v25, 0.0  ;;  %v692_v33 = vmax.f32 %v620_v26, 0.0  ;;  %v548_v34 = vadd.f32 %v2690_v21, %v547_v30  ;;  %v612_v35 = vadd.f32 %v2690_v21, %v611_v31  ;;  %v2771_v25 = vld [vmem:[%s3965_s3 + $0x7] ss:$0 sm:$0xff] }
  0xe8   : > { %v2335_v38 = vpop.f32.mrf.mxu0  ;;  %v2351_v39 = vpop.f32.mrf.mxu1 }
  0xe9   : > { %v2708_v43 = vmin.f32 %v676_v32, 6.0  ;;  %v2710_v44 = vmin.f32 %v692_v33, 6.0  ;;  %v674_v45 = vmax.f32 %v548_v34, 0.0  ;;  %v690_v46 = vmax.f32 %v612_v35, 0.0 }
  0xea   : > { %v559_v48 = vadd.f32 %v2335_v38, %v2690_v21  ;;  %v623_v49 = vadd.f32 %v2351_v39, %v2690_v21  ;;  %v550_v50 = vpop.f32.mrf.mxu0  ;;  %v614_v51 = vpop.f32.mrf.mxu1  ;;  %v1017_v32 = vadd.f32 %v985_v0, %v913_v63  ;;  %v2777_v35 = vadd.f32 %v986_v10, %v914_v9 }
  0xeb   : > { %4006 = vst [vmem:[#allocation6_spill] sm:$0xff] %v2708_v43  ;;  %4007 = vst [vmem:[#allocation7_spill] sm:$0xff] %v2710_v44  ;;  %v2725_v54 = vmin.f32 %v674_v45, 6.0  ;;  %v2727_v55 = vmin.f32 %v690_v46, 6.0  ;;  %v551_v56 = vadd.f32 %v2690_v21, %v550_v50  ;;  %v615_v57 = vadd.f32 %v2690_v21, %v614_v51  ;;  %v2801_v50 = vld [vmem:[%s3965_s3 + $0x4] ss:$0 sm:$0xff] }
  0xec   : > { %740 = vst.msk [vmem:[#allocation2 + $0x31] sm:$0xff] %vm271_vm0, %v2708_v43  ;;  %756 = vst.msk [vmem:[#allocation2 + $0xf1] sm:$0xff] %vm271_vm0, %v2710_v44  ;;  %v677_v59 = vmax.f32 %v559_v48, 0.0  ;;  %v693_v60 = vmax.f32 %v623_v49, 0.0  ;;  %v2338_v61 = vpop.f32.mrf.mxu0  ;;  %v2354_v62 = vpop.f32.mrf.mxu1 }
  0xed   : > { %4008 = vst [vmem:[#allocation8_spill] sm:$0xff] %v2725_v54  ;;  %4009 = vst [vmem:[#allocation9_spill] sm:$0xff] %v2727_v55  ;;  %v675_v1 = vmax.f32 %v551_v56, 0.0  ;;  %v691_v2 = vmax.f32 %v615_v57, 0.0  ;;  %v572_v3 = vadd.f32 %v2338_v61, %v2690_v21  ;;  %v636_v4 = vadd.f32 %v2354_v62, %v2690_v21 }
  0xee   : > { %738 = vst.msk [vmem:[#allocation2 + $0x19] sm:$0xff] %vm271_vm0, %v2725_v54  ;;  %754 = vst.msk [vmem:[#allocation2 + $0xd9] sm:$0xff] %vm271_vm0, %v2727_v55  ;;  %v2738_v5 = vmin.f32 %v677_v59, 6.0  ;;  %v2740_v6 = vmin.f32 %v693_v60, 6.0  ;;  %v563_v7 = vpop.f32.mrf.mxu0  ;;  %v627_v8 = vpop.f32.mrf.mxu1  ;;  %v2818_v59 = vld [vmem:[%s3965_s3 + $0x8] ss:$0 sm:$0xff] }
  0xef   : > { %v2743_v11 = vmin.f32 %v675_v1, 6.0  ;;  %v2745_v12 = vmin.f32 %v691_v2, 6.0  ;;  %v680_v13 = vmax.f32 %v572_v3, 0.0  ;;  %v696_v14 = vmax.f32 %v636_v4, 0.0 }
  0xf0   : > { %4010 = vst [vmem:[#allocation10_spill] sm:$0xff] %v2738_v5  ;;  %4011 = vst [vmem:[#allocation11_spill] sm:$0xff] %v2740_v6  ;;  %v564_v15 = vadd.f32 %v2690_v21, %v563_v7  ;;  %v628_v16 = vadd.f32 %v2690_v21, %v627_v8  ;;  %v2339_v17 = vpop.f32.mrf.mxu0  ;;  %v2355_v18 = vpop.f32.mrf.mxu1 }
  0xf1   : > { %4012 = vst [vmem:[#allocation12_spill] sm:$0xff] %v2743_v11  ;;  %4013 = vst [vmem:[#allocation13_spill] sm:$0xff] %v2745_v12  ;;  %v2757_v19 = vmin.f32 %v680_v13, 6.0  ;;  %v2759_v20 = vmin.f32 %v696_v14, 6.0  ;;  %v575_v22 = vadd.f32 %v2339_v17, %v2690_v21  ;;  %v639_v23 = vadd.f32 %v2355_v18, %v2690_v21 }
  0xf2   : > { %741 = vst.msk [vmem:[#allocation2 + $0x39] sm:$0xff] %vm271_vm0, %v2738_v5  ;;  %757 = vst.msk [vmem:[#allocation2 + $0xf9] sm:$0xff] %vm271_vm0, %v2740_v6  ;;  %v678_v26 = vmax.f32 %v564_v15, 0.0  ;;  %v694_v28 = vmax.f32 %v628_v16, 0.0  ;;  %v566_v30 = vpop.f32.mrf.mxu0  ;;  %v630_v31 = vpop.f32.mrf.mxu1 }
  0xf3   : > { %739 = vst.msk [vmem:[#allocation2 + $0x21] sm:$0xff] %vm271_vm0, %v2743_v11  ;;  %755 = vst.msk [vmem:[#allocation2 + $0xe1] sm:$0xff] %vm271_vm0, %v2745_v12  ;;  %v2773_v33 = vld [vmem:[#allocation2 + $0x30] sm:$0xff]  ;;  %v681_v36 = vmax.f32 %v575_v22, 0.0  ;;  %v697_v37 = vmax.f32 %v639_v23, 0.0  ;;  %v567_v38 = vadd.f32 %v2690_v21, %v566_v30  ;;  %v631_v39 = vadd.f32 %v2690_v21, %v630_v31 }
  0xf4   : > { %4014 = vst [vmem:[#allocation14_spill] sm:$0xff] %v2757_v19  ;;  %4015 = vst [vmem:[#allocation15_spill] sm:$0xff] %v2759_v20  ;;  %v2775_v34 = vld [vmem:[#allocation2 + $0x31] sm:$0xff]  ;;  %v2790_v41 = vmin.f32 %v678_v26, 6.0  ;;  %v2792_v42 = vmin.f32 %v694_v28, 6.0  ;;  %v2342_v45 = vpop.f32.mrf.mxu0  ;;  %v2358_v46 = vpop.f32.mrf.mxu1  ;;  %v2805_v51 = vmul.f32 %v2766_v24, %v2773_v33 }
  0xf5   : > { %744 = vst.msk [vmem:[#allocation2 + $0x61] sm:$0xff] %vm271_vm0, %v2757_v19  ;;  %760 = vst.msk [vmem:[#allocation2 + $0x121] sm:$0xff] %vm271_vm0, %v2759_v20  ;;  %v2794_v48 = vld [vmem:[#allocation2 + $0x18] sm:$0xff]  ;;  %v2809_v52 = vmul.f32 %v2771_v25, %v2775_v34  ;;  %v2811_v53 = vmin.f32 %v681_v36, 6.0  ;;  %v2813_v56 = vmin.f32 %v697_v37, 6.0  ;;  %v679_v57 = vmax.f32 %v567_v38, 0.0 }
  0xf6   : > { %4016 = vst [vmem:[#allocation16_spill] sm:$0xff] %v2790_v41  ;;  %4017 = vst [vmem:[#allocation17_spill] sm:$0xff] %v2792_v42  ;;  %v2796_v49 = vld [vmem:[#allocation2 + $0x19] sm:$0xff]  ;;  %v695_v58 = vmax.f32 %v631_v39, 0.0  ;;  %v588_v60 = vadd.f32 %v2342_v45, %v2690_v21  ;;  %v652_v61 = vadd.f32 %v2358_v46, %v2690_v21  ;;  %v579_v62 = vpop.f32.mrf.mxu0  ;;  %v643_v63 = vpop.f32.mrf.mxu1  ;;  %v1089_v0 = vmul.f32 %v2788_v40, %v2794_v48  ;;  %v2857_v28 = vld [vmem:[%s3965_s3 + $0x5] ss:$0 sm:$0xff] }
  0xf7   : > { %4018 = vst [vmem:[#allocation18_spill] sm:$0xff] %v2811_v53  ;;  %4019 = vst [vmem:[#allocation19_spill] sm:$0xff] %v2813_v56  ;;  %v1193_v1 = vmul.f32 %v2801_v50, %v2796_v49  ;;  %v2834_v2 = vmin.f32 %v679_v57, 6.0  ;;  %v580_v4 = vadd.f32 %v2690_v21, %v579_v62  ;;  %v644_v7 = vadd.f32 %v2690_v21, %v643_v63  ;;  %v859_v55 = vld [vmem:[#allocation2 + $0xd9] sm:$0xff] }
  0xf8   : > { %742 = vst.msk [vmem:[#allocation2 + $0x49] sm:$0xff] %vm271_vm0, %v2790_v41  ;;  %758 = vst.msk [vmem:[#allocation2 + $0x109] sm:$0xff] %vm271_vm0, %v2792_v42  ;;  %v2836_v3 = vmin.f32 %v695_v58, 6.0  ;;  %v684_v9 = vmax.f32 %v588_v60, 0.0  ;;  %v700_v10 = vmax.f32 %v652_v61, 0.0  ;;  %v2343_v13 = vpop.f32.mrf.mxu0  ;;  %v2359_v14 = vpop.f32.mrf.mxu1  ;;  %v1121_v15 = vadd.f32 %v1089_v0, %v1017_v32 }
  0xf9   : > { %745 = vst.msk [vmem:[#allocation2 + $0x69] sm:$0xff] %vm271_vm0, %v2811_v53  ;;  %761 = vst.msk [vmem:[#allocation2 + $0x129] sm:$0xff] %vm271_vm0, %v2813_v56  ;;  %v2840_v8 = vld [vmem:[#allocation2 + $0x32] sm:$0xff]  ;;  %v682_v18 = vmax.f32 %v580_v4, 0.0  ;;  %v698_v22 = vmax.f32 %v644_v7, 0.0  ;;  %v591_v23 = vadd.f32 %v2343_v13, %v2690_v21  ;;  %v655_v26 = vadd.f32 %v2359_v14, %v2690_v21  ;;  %v3078_v5 = vld [vmem:[#allocation2 + $0xfa] sm:$0xff] }
  0xfa   : > { %4020 = vst [vmem:[#allocation20_spill] sm:$0xff] %v2834_v2  ;;  %4021 = vst [vmem:[#allocation21_spill] sm:$0xff] %v2836_v3  ;;  %v2842_v16 = vld [vmem:[#allocation2 + $0x1a] sm:$0xff]  ;;  %v2846_v17 = vmul.f32 %v2818_v59, %v2840_v8  ;;  %v2861_v31 = vmin.f32 %v684_v9, 6.0  ;;  %v2863_v32 = vmin.f32 %v700_v10, 6.0  ;;  %v582_v36 = vpop.f32.mrf.mxu0  ;;  %v646_v37 = vpop.f32.mrf.mxu1  ;;  %v1225_v38 = vadd.f32 %v1193_v1, %v1121_v15 }
  0xfb   : > { %743 = vst.msk [vmem:[#allocation2 + $0x51] sm:$0xff] %vm271_vm0, %v2834_v2  ;;  %759 = vst.msk [vmem:[#allocation2 + $0x111] sm:$0xff] %vm271_vm0, %v2836_v3  ;;  %v2859_v30 = vld [vmem:[#allocation2 + $0x20] sm:$0xff]  ;;  %v1297_v39 = vmul.f32 %v2857_v28, %v2842_v16  ;;  %v2867_v45 = vmin.f32 %v682_v18, 6.0  ;;  %v2869_v46 = vmin.f32 %v698_v22, 6.0  ;;  %v685_v57 = vmax.f32 %v591_v23, 0.0 }
  0xfc   : > { %4022 = vst [vmem:[#allocation22_spill] sm:$0xff] %v2861_v31  ;;  %4023 = vst [vmem:[#allocation23_spill] sm:$0xff] %v2863_v32  ;;  %v701_v58 = vmax.f32 %v655_v26, 0.0  ;;  %v583_v60 = vadd.f32 %v2690_v21, %v582_v36  ;;  %v647_v61 = vadd.f32 %v2690_v21, %v646_v37  ;;  %v2346_v62 = vpop.f32.mrf.mxu0  ;;  %v2362_v63 = vpop.f32.mrf.mxu1  ;;  %v1090_v1 = vmul.f32 %v2788_v40, %v2859_v30  ;;  %v2889_v13 = vld [vmem:[#allocation2 + $0x21] sm:$0xff] }
  0xfd   : > { %4024 = vst [vmem:[#allocation24_spill] sm:$0xff] %v2867_v45  ;;  %4025 = vst [vmem:[#allocation25_spill] sm:$0xff] %v2869_v46  ;;  %v1329_v0 = vadd.f32 %v1297_v39, %v1225_v38  ;;  %v2883_v4 = vmin.f32 %v685_v57, 6.0  ;;  %v604_v9 = vadd.f32 %v2346_v62, %v2690_v21  ;;  %v668_v10 = vadd.f32 %v2362_v63, %v2690_v21 }
  0xfe   : > { %748 = vst.msk [vmem:[#allocation2 + $0x91] sm:$0xff] %vm271_vm0, %v2861_v31  ;;  %764 = vst.msk [vmem:[#allocation2 + $0x151] sm:$0xff] %vm271_vm0, %v2863_v32  ;;  %v2885_v7 = vmin.f32 %v701_v58, 6.0  ;;  %v683_v14 = vmax.f32 %v583_v60, 0.0  ;;  %v699_v15 = vmax.f32 %v647_v61, 0.0  ;;  %v595_v18 = vpop.f32.mrf.mxu0  ;;  %v659_v22 = vpop.f32.mrf.mxu1  ;;  %v1122_v26 = vadd.f32 %v1090_v1, %v2777_v35 }
  0xff   : > { %746 = vst.msk [vmem:[#allocation2 + $0x79] sm:$0xff] %vm271_vm0, %v2867_v45  ;;  %762 = vst.msk [vmem:[#allocation2 + $0x139] sm:$0xff] %vm271_vm0, %v2869_v46  ;;  %v1434_v23 = vadd.f32 %v2805_v51, %v1329_v0  ;;  %v688_v36 = vmax.f32 %v604_v9, 0.0  ;;  %v596_v37 = vadd.f32 %v2690_v21, %v595_v18  ;;  %v704_v38 = vmax.f32 %v668_v10, 0.0  ;;  %v2914_v9 = vld [vmem:[%s3966_s4] ss:$0 sm:$0xff] }
 0x100   : > { %4026 = vst [vmem:[#allocation26_spill] sm:$0xff] %v2883_v4  ;;  %4027 = vst [vmem:[#allocation27_spill] sm:$0xff] %v2885_v7  ;;  %v660_v39 = vadd.f32 %v2690_v21, %v659_v22  ;;  %v2899_v57 = vmin.f32 %v683_v14, 6.0  ;;  %v2901_v58 = vmin.f32 %v699_v15, 6.0  ;;  %v2347_v60 = vpop.f32.mrf.mxu0  ;;  %v2363_v51 = vpop.f32.mrf.mxu1  ;;  %v1194_v61 = vmul.f32 %v2801_v50, %v2889_v13  ;;  %v2916_v10 = vld [vmem:[#allocation2 + $0x22] sm:$0xff] }
 0x101   : > { %749 = vst.msk [vmem:[#allocation2 + $0x99] sm:$0xff] %vm271_vm0, %v2883_v4  ;;  %765 = vst.msk [vmem:[#allocation2 + $0x159] sm:$0xff] %vm271_vm0, %v2885_v7  ;;  %v1538_v35 = vadd.f32 %v2809_v52, %v1434_v23  ;;  %v2906_v62 = vmin.f32 %v688_v36, 6.0  ;;  %v686_v63 = vmax.f32 %v596_v37, 0.0  ;;  %v607_v0 = vadd.f32 %v2347_v60, %v2690_v21  ;;  %v2924_v36 = vld [vmem:[#allocation2 + $0x38] sm:$0xff]  ;;  %v2998_v7 = vld [vmem:[#allocation2 + $0xf0] sm:$0xff] }
 0x102   : > { %4028 = vst [vmem:[#allocation28_spill] sm:$0xff] %v2899_v57  ;;  %4029 = vst [vmem:[#allocation29_spill] sm:$0xff] %v2901_v58  ;;  %v2909_v1 = vmin.f32 %v704_v38, 6.0  ;;  %v598_v52 = vpop.f32.mrf.mxu0  ;;  %v702_v14 = vmax.f32 %v660_v39, 0.0  ;;  %v671_v15 = vadd.f32 %v2363_v51, %v2690_v21  ;;  %v662_v18 = vpop.f32.mrf.mxu1  ;;  %v1226_v23 = vadd.f32 %v1194_v61, %v1122_v26  ;;  %v2934_v51 = vld [vmem:[#allocation2 + $0x39] sm:$0xff]  ;;  %v3011_v31 = vld [vmem:[#allocation2 + $0x108] sm:$0xff] }
 0x103   : > { %4030 = vst [vmem:[#allocation30_spill] sm:$0xff] %v2906_v62  ;;  %747 = vst.msk [vmem:[#allocation2 + $0x81] sm:$0xff] %vm271_vm0, %v2899_v57  ;;  %v1642_v22 = vadd.f32 %v2846_v17, %v1538_v35  ;;  %v2928_v37 = vmin.f32 %v686_v63, 6.0  ;;  %v689_v38 = vmax.f32 %v607_v0, 0.0  ;;  %v599_v60 = vadd.f32 %v2690_v21, %v598_v52  ;;  %v2941_v61 = vld [vmem:[#allocation2 + $0x3a] sm:$0xff]  ;;  %v3034_v45 = vld [vmem:[#allocation2 + $0x52] sm:$0xff] }
 0x104   : > { %4031 = vst [vmem:[#allocation31_spill] sm:$0xff] %v2909_v1  ;;  %763 = vst.msk [vmem:[#allocation2 + $0x141] sm:$0xff] %vm271_vm0, %v2901_v58  ;;  %v663_v39 = vadd.f32 %v2690_v21, %v662_v18  ;;  %v2936_v12 = vmin.f32 %v702_v14, 6.0  ;;  %v705_v17 = vmax.f32 %v671_v15, 0.0  ;;  %v1298_v35 = vmul.f32 %v2857_v28, %v2916_v10 }
 0x105   : > { %752 = vst.msk [vmem:[#allocation2 + $0xc1] sm:$0xff] %vm271_vm0, %v2906_v62  ;;  %4032 = vst [vmem:[#allocation32_spill] sm:$0xff] %v2928_v37  ;;  %v1681_v26 = vadd.f32 %v2914_v9, %v1642_v22  ;;  %v2945_v63 = vmin.f32 %v689_v38, 6.0  ;;  %v687_v0 = vmax.f32 %v599_v60, 0.0  ;;  %v1403_v21 = vmul.f32 %v2766_v24, %v2924_v36  ;;  %v2975_v62 = vld [vmem:[#allocation2 + $0x48] sm:$0xff] }
 0x106   : > { %768 = vst.msk [vmem:[#allocation2 + $0x181] sm:$0xff] %vm271_vm0, %v2909_v1  ;;  %4033 = vst [vmem:[#allocation33_spill] sm:$0xff] %v2936_v12  ;;  %v703_v52 = vmax.f32 %v663_v39, 0.0  ;;  %v2951_v14 = vmin.f32 %v705_v17, 6.0  ;;  %v1330_v18 = vadd.f32 %v1298_v35, %v1226_v23  ;;  %v1507_v22 = vmul.f32 %v2771_v25, %v2934_v51  ;;  %v2965_v17 = vld [vmem:[#allocation2 + $0x49] sm:$0xff]  ;;  %v788_v23 = vld [vmem:[#allocation2 + $0xd8] sm:$0xff] }
 0x107   : > { %750 = vst.msk [vmem:[#allocation2 + $0xa9] sm:$0xff] %vm271_vm0, %v2928_v37  ;;  %4034 = vst [vmem:[#allocation34_spill] sm:$0xff] %v2945_v63  ;;  %v1713_v15 = vmax.f32 %v1681_v26, 0.0  ;;  %v2957_v38 = vmin.f32 %v687_v0, 6.0  ;;  %v1611_v39 = vmul.f32 %v2818_v59, %v2941_v61  ;;  %v811_v1 = vmul.f32 %v2697_v27, %v2794_v48  ;;  %v2967_v26 = vld [vmem:[#allocation2 + $0x4a] sm:$0xff]  ;;  %v963_v48 = vld [vmem:[#allocation2 + $0xda] sm:$0xff] }
 0x108   : > { %766 = vst.msk [vmem:[#allocation2 + $0x169] sm:$0xff] %vm271_vm0, %v2936_v12  ;;  %4035 = vst [vmem:[#allocation35_spill] sm:$0xff] %v2951_v14  ;;  %v2959_v60 = vmin.f32 %v703_v52, 6.0  ;;  %v883_v0 = vmul.f32 %v2702_v29, %v2796_v49  ;;  %v987_v52 = vmul.f32 %v2715_v47, %v2842_v16  ;;  %v1299_v49 = vmul.f32 %v2857_v28, %v2840_v8 }
 0x109   : > { %753 = vst.msk [vmem:[#allocation2 + $0xc9] sm:$0xff] %vm271_vm0, %v2945_v63  ;;  %4036 = vst [vmem:[#allocation36_spill] sm:$0xff] %v2957_v38  ;;  %v1745_v35 = vmin.f32 %v1713_v15, 6.0  ;;  %v1435_v63 = vadd.f32 %v1403_v21, %v1330_v18  ;;  %v1091_v15 = vmul.f32 %v2788_v40, %v2773_v33  ;;  %v1195_v21 = vmul.f32 %v2801_v50, %v2775_v34  ;;  %v2989_v18 = vld [vmem:[#allocation2 + $0xf2] sm:$0xff] }
 0x10a   : > { %4037 = vst [vmem:[#allocation37_spill] sm:$0xff] %v2959_v60  ;;  %769 = vst.msk [vmem:[#allocation2 + $0x189] sm:$0xff] %vm271_vm0, %v2951_v14  ;;  %v1404_v16 = vmul.f32 %v2766_v24, %v2975_v62  ;;  %v2996_v12 = vmul.f32 %v2818_v59, %v2967_v26  ;;  %v827_v37 = vmul.f32 %v2697_v27, %v788_v23  ;;  %v3013_v23 = vld [vmem:[#allocation2 + $0x109] sm:$0xff] }
 0x10b   : > { %751 = vst.msk [vmem:[#allocation2 + $0xb1] sm:$0xff] %vm271_vm0, %v2957_v38  ;;  %767 = vst.msk [vmem:[#allocation2 + $0x171] sm:$0xff] %vm271_vm0, %v2959_v60  ;;  %1809 = vrot.lane.b32.xlu0 %v1745_v35, %s2508_s18  ;;  %v1539_v14 = vadd.f32 %v1507_v22, %v1435_v63  ;;  %v915_v38 = vadd.f32 %v883_v0, %v811_v1  ;;  %v1508_v60 = vmul.f32 %v2771_v25, %v2965_v17  ;;  %v3005_v63 = vld [vmem:[#allocation2 + $0xf1] sm:$0xff] }
 0x10c   : > { %v899_v4 = vmul.f32 %v2702_v29, %v859_v55  ;;  %v1003_v32 = vmul.f32 %v2715_v47, %v963_v48  ;;  %v1107_v35 = vmul.f32 %v2788_v40, %v2998_v7  ;;  %v1211_v0 = vmul.f32 %v2801_v50, %v3005_v63  ;;  %v3015_v55 = vld [vmem:[#allocation2 + $0x10a] sm:$0xff] }
 0x10d   : > { %v1643_v1 = vadd.f32 %v1611_v39, %v1539_v14  ;;  %v1019_v22 = vadd.f32 %v987_v52, %v915_v38  ;;  %v1315_v58 = vmul.f32 %v2857_v28, %v2989_v18  ;;  %v1420_v57 = vmul.f32 %v2766_v24, %v3011_v31 }
 0x10e   : > { %v931_v48 = vadd.f32 %v899_v4, %v827_v37  ;;  %v1524_v14 = vmul.f32 %v2771_v25, %v3013_v23  ;;  %v3023_v38 = vmul.f32 %v2818_v59, %v3015_v55  ;;  %v812_v46 = vmul.f32 %v2697_v27, %v2859_v30  ;;  %v3030_v4 = vld [vmem:[#allocation2 + $0x50] sm:$0xff] }
 0x10f   : > { %v1682_v39 = vadd.f32 %v2914_v9, %v1643_v1  ;;  %v1123_v52 = vadd.f32 %v1091_v15, %v1019_v22  ;;  %v884_v56 = vmul.f32 %v2702_v29, %v2889_v13  ;;  %v3032_v37 = vld [vmem:[#allocation2 + $0x51] sm:$0xff]  ;;  %v988_v20 = vmul.f32 %v2715_v47, %v2916_v10 }
 0x110   : > { %v1035_v53 = vadd.f32 %v1003_v32, %v931_v48  ;;  %v1092_v1 = vmul.f32 %v2788_v40, %v2924_v36  ;;  %v1196_v15 = vmul.f32 %v2801_v50, %v2934_v51  ;;  %v1300_v13 = vmul.f32 %v2857_v28, %v2941_v61 }
 0x111   : > { %v1714_v30 = vmax.f32 %v1682_v39, 0.0  ;;  %v1227_v22 = vadd.f32 %v1195_v21, %v1123_v52  ;;  %v916_v3 = vadd.f32 %v884_v56, %v812_v46  ;;  %v1405_v2 = vmul.f32 %v2766_v24, %v3030_v4  ;;  %v3060_v39 = vld [vmem:[#allocation2 + $0x60] sm:$0xff] }
 0x112   : > { %v1139_v19 = vadd.f32 %v1107_v35, %v1035_v53  ;;  %v1509_v32 = vmul.f32 %v2771_v25, %v3032_v37  ;;  %v3050_v10 = vmul.f32 %v2818_v59, %v3034_v45  ;;  %v813_v56 = vmul.f32 %v2697_v27, %v2773_v33  ;;  %v3062_v52 = vld [vmem:[#allocation2 + $0x62] sm:$0xff] }
 0x113   : > { %v1746_v48 = vmin.f32 %v1714_v30, 6.0  ;;  %v1331_v42 = vadd.f32 %v1299_v49, %v1227_v22  ;;  %v1020_v6 = vadd.f32 %v988_v20, %v916_v3  ;;  %v885_v53 = vmul.f32 %v2702_v29, %v2775_v34  ;;  %v789_v30 = vld [vmem:[#allocation2 + $0xe0] sm:$0xff] }
 0x114   : > { %v1243_v46 = vadd.f32 %v1211_v0, %v1139_v19  ;;  %v989_v21 = vmul.f32 %v2715_v47, %v2840_v8  ;;  %v1093_v35 = vmul.f32 %v2788_v40, %v2975_v62  ;;  %v1197_v19 = vmul.f32 %v2801_v50, %v2965_v17  ;;  %v3069_v34 = vld [vmem:[#allocation2 + $0x61] sm:$0xff] }
 0x115   : > { %1811 = vrot.lane.b32.xlu0 %v1746_v48, %s2508_s18  ;;  %v1436_v20 = vadd.f32 %v1404_v16, %v1331_v42  ;;  %v1124_v3 = vadd.f32 %v1092_v1, %v1020_v6  ;;  %v1301_v33 = vmul.f32 %v2857_v28, %v2967_v26  ;;  %v860_v8 = vld [vmem:[#allocation2 + $0xe1] sm:$0xff]  ;;  %v917_v22 = vadd.f32 %v885_v53, %v813_v56  ;;  %v3084_v53 = vld [vmem:[#allocation2 + $0xf9] sm:$0xff] }
 0x116   : > { %v964_v49 = vld [vmem:[#allocation2 + $0xe2] sm:$0xff]  ;;  %v1347_v0 = vadd.f32 %v1315_v58, %v1243_v46  ;;  %v1406_v41 = vmul.f32 %v2766_v24, %v3060_v39  ;;  %v1510_v48 = vmul.f32 %v2771_v25, %v3069_v34  ;;  %v1614_v16 = vmul.f32 %v2818_v59, %v3062_v52  ;;  %v3082_v46 = vld [vmem:[#allocation2 + $0xf8] sm:$0xff] }
 0x117   : > { %v1540_v42 = vadd.f32 %v1508_v60, %v1436_v20  ;;  %v1228_v6 = vadd.f32 %v1196_v15, %v1124_v3  ;;  %v828_v1 = vmul.f32 %v2697_v27, %v789_v30  ;;  %v1021_v43 = vadd.f32 %v989_v21, %v917_v22  ;;  %v3091_v3 = vld [vmem:[#allocation2 + $0x112] sm:$0xff] }
 0x118   : > { %v1452_v44 = vadd.f32 %v1420_v57, %v1347_v0  ;;  %v900_v58 = vmul.f32 %v2702_v29, %v860_v8  ;;  %v1004_v56 = vmul.f32 %v2715_v47, %v964_v49  ;;  %v1108_v20 = vmul.f32 %v2788_v40, %v3082_v46  ;;  %v3095_v0 = vld [vmem:[#allocation2 + $0x110] sm:$0xff] }
 0x119   : > { %v1644_v60 = vadd.f32 %v2996_v12, %v1540_v42  ;;  %v1332_v15 = vadd.f32 %v1300_v13, %v1228_v6  ;;  %v1212_v30 = vmul.f32 %v2801_v50, %v3084_v53  ;;  %v1125_v21 = vadd.f32 %v1093_v35, %v1021_v43  ;;  %v3097_v22 = vld [vmem:[#allocation2 + $0x111] sm:$0xff] }
 0x11a   : > { %v1556_v57 = vadd.f32 %v1524_v14, %v1452_v44  ;;  %v932_v8 = vadd.f32 %v900_v58, %v828_v1  ;;  %v1316_v49 = vmul.f32 %v2857_v28, %v3078_v5  ;;  %v1421_v42 = vmul.f32 %v2766_v24, %v3095_v0 }
 0x11b   : > { %v1683_v12 = vadd.f32 %v2914_v9, %v1644_v60  ;;  %v1437_v13 = vadd.f32 %v1405_v2, %v1332_v15  ;;  %v1525_v6 = vmul.f32 %v2771_v25, %v3097_v22  ;;  %v1229_v43 = vadd.f32 %v1197_v19, %v1125_v21 }
 0x11c   : > { %v1660_v44 = vadd.f32 %v3023_v38, %v1556_v57  ;;  %v1036_v14 = vadd.f32 %v1004_v56, %v932_v8  ;;  %v1629_v35 = vmul.f32 %v2818_v59, %v3091_v3  ;;  %v829_v11 = vmul.f32 %v2697_v27, %v2998_v7 }
 0x11d   : > { %v1715_v1 = vmax.f32 %v1683_v12, 0.0  ;;  %v1541_v58 = vadd.f32 %v1509_v32, %v1437_v13  ;;  %v901_v2 = vmul.f32 %v2702_v29, %v3005_v63  ;;  %v1333_v15 = vadd.f32 %v1301_v33, %v1229_v43  ;;  %v3119_v12 = vld [vmem:[#allocation2 + $0x120] sm:$0xff] }
 0x11e   : > { %v1699_v60 = vadd.f32 %v2914_v9, %v1660_v44  ;;  %v1140_v54 = vadd.f32 %v1108_v20, %v1036_v14  ;;  %v1005_v38 = vmul.f32 %v2715_v47, %v2989_v18  ;;  %v1109_v32 = vmul.f32 %v2788_v40, %v3011_v31  ;;  %v3121_v33 = vld [vmem:[#allocation2 + $0x122] sm:$0xff] }
 0x11f   : > { %v1747_v19 = vmin.f32 %v1715_v1, 6.0  ;;  %v1645_v56 = vadd.f32 %v3050_v10, %v1541_v58  ;;  %v933_v57 = vadd.f32 %v901_v2, %v829_v11  ;;  %v1438_v8 = vadd.f32 %v1406_v41, %v1333_v15  ;;  %v3129_v41 = vld [vmem:[#allocation2 + $0x121] sm:$0xff] }
 0x120   : > { %v1731_v21 = vmax.f32 %v1699_v60, 0.0  ;;  %v1244_v7 = vadd.f32 %v1212_v30, %v1140_v54  ;;  %v1213_v63 = vmul.f32 %v2801_v50, %v3013_v23  ;;  %v1317_v11 = vmul.f32 %v2857_v28, %v3015_v55 }
 0x121   : > { %1813 = vrot.lane.b32.xlu1 %v1747_v19, %s2508_s18  ;;  %v1684_v18 = vadd.f32 %v2914_v9, %v1645_v56  ;;  %v1037_v20 = vadd.f32 %v1005_v38, %v933_v57  ;;  %v1422_v10 = vmul.f32 %v2766_v24, %v3119_v12  ;;  %v1542_v30 = vadd.f32 %v1510_v48, %v1438_v8  ;;  %v3144_v38 = vld [vmem:[#allocation2 + $0x69] sm:$0xff] }
 0x122   : > { %v1763_v54 = vmin.f32 %v1731_v21, 6.0  ;;  %v1348_v13 = vadd.f32 %v1316_v49, %v1244_v7  ;;  %v1526_v44 = vmul.f32 %v2771_v25, %v3129_v41  ;;  %v1630_v1 = vmul.f32 %v2818_v59, %v3121_v33  ;;  %v3142_v49 = vld [vmem:[#allocation2 + $0x68] sm:$0xff] }
 0x123   : > { %v1716_v43 = vmax.f32 %v1684_v18, 0.0  ;;  %v1141_v14 = vadd.f32 %v1109_v32, %v1037_v20  ;;  %v814_v58 = vmul.f32 %v2697_v27, %v2924_v36  ;;  %v1646_v2 = vadd.f32 %v1614_v16, %v1542_v30  ;;  %v3146_v19 = vld [vmem:[#allocation2 + $0x6a] sm:$0xff] }
 0x124   : > { %1845 = vrot.lane.b32.xlu0 %v1763_v54, %s2508_s18  ;;  %v1453_v60 = vadd.f32 %v1421_v42, %v1348_v13  ;;  %v886_v15 = vmul.f32 %v2702_v29, %v2934_v51  ;;  %v990_v48 = vmul.f32 %v2715_v47, %v2941_v61  ;;  %v1094_v36 = vmul.f32 %v2788_v40, %v3030_v4 }
 0x125   : > { %v1748_v56 = vmin.f32 %v1716_v43, 6.0  ;;  %v1245_v57 = vadd.f32 %v1213_v63, %v1141_v14  ;;  %v1198_v16 = vmul.f32 %v2801_v50, %v3032_v37  ;;  %v1685_v42 = vadd.f32 %v2914_v9, %v1646_v2 }
 0x126   : > { %v1557_v51 = vadd.f32 %v1525_v6, %v1453_v60  ;;  %v918_v32 = vadd.f32 %v886_v15, %v814_v58  ;;  %v1302_v61 = vmul.f32 %v2857_v28, %v3034_v45  ;;  %v1407_v8 = vmul.f32 %v2766_v24, %v3142_v49  ;;  %v3173_v60 = vld [vmem:[#allocation2 + $0x78] sm:$0xff] }
 0x127   : > { %1815 = vrot.lane.b32.xlu1 %v1748_v56, %s2508_s18  ;;  %v1349_v21 = vadd.f32 %v1317_v11, %v1245_v57  ;;  %v1511_v7 = vmul.f32 %v2771_v25, %v3144_v38  ;;  %v1615_v63 = vmul.f32 %v2818_v59, %v3146_v19  ;;  %v1717_v18 = vmax.f32 %v1685_v42, 0.0  ;;  %v3179_v15 = vld [vmem:[#allocation2 + $0x79] sm:$0xff] }
 0x128   : > { %v1661_v20 = vadd.f32 %v1629_v35, %v1557_v51  ;;  %v1022_v54 = vadd.f32 %v990_v48, %v918_v32  ;;  %v815_v6 = vmul.f32 %v2697_v27, %v2975_v62  ;;  %v887_v13 = vmul.f32 %v2702_v29, %v2965_v17  ;;  %v3181_v48 = vld [vmem:[#allocation2 + $0x7a] sm:$0xff] }
 0x129   : > { %v1454_v30 = vadd.f32 %v1422_v10, %v1349_v21  ;;  %v991_v11 = vmul.f32 %v2715_v47, %v2967_v26  ;;  %v1095_v43 = vmul.f32 %v2788_v40, %v3060_v39  ;;  %v1749_v14 = vmin.f32 %v1717_v18, 6.0 }
 0x12a   : > { %v1700_v58 = vadd.f32 %v2914_v9, %v1661_v20  ;;  %v1126_v2 = vadd.f32 %v1094_v36, %v1022_v54  ;;  %v1199_v35 = vmul.f32 %v2801_v50, %v3069_v34  ;;  %v919_v10 = vadd.f32 %v887_v13, %v815_v6  ;;  %v3196_v6 = vld [vmem:[#allocation2 + $0x12a] sm:$0xff] }
 0x12b   : > { %v1558_v62 = vadd.f32 %v1526_v44, %v1454_v30  ;;  %v1303_v17 = vmul.f32 %v2857_v28, %v3062_v52  ;;  %v1408_v26 = vmul.f32 %v2766_v24, %v3173_v60  ;;  %1817 = vrot.lane.b32.xlu0 %v1749_v14, %s2508_s18  ;;  %v1512_v36 = vmul.f32 %v2771_v25, %v3179_v15 }
 0x12c   : > { %v1732_v56 = vmax.f32 %v1700_v58, 0.0  ;;  %v1230_v57 = vadd.f32 %v1198_v16, %v1126_v2  ;;  %v1616_v44 = vmul.f32 %v2818_v59, %v3181_v48  ;;  %v1023_v51 = vadd.f32 %v991_v11, %v919_v10  ;;  %v3201_v11 = vld [vmem:[#allocation2 + $0x128] sm:$0xff] }
 0x12d   : > { %v1662_v42 = vadd.f32 %v1630_v1, %v1558_v62  ;;  %v830_v32 = vmul.f32 %v2697_v27, %v3082_v46  ;;  %v902_v21 = vmul.f32 %v2702_v29, %v3084_v53  ;;  %v1006_v54 = vmul.f32 %v2715_v47, %v3078_v5  ;;  %v3203_v53 = vld [vmem:[#allocation2 + $0x129] sm:$0xff] }
 0x12e   : > { %v1764_v18 = vmin.f32 %v1732_v56, 6.0  ;;  %v1334_v20 = vadd.f32 %v1302_v61, %v1230_v57  ;;  %v1110_v16 = vmul.f32 %v2788_v40, %v3095_v0  ;;  %v1127_v1 = vadd.f32 %v1095_v43, %v1023_v51 }
 0x12f   : > { %v1701_v30 = vadd.f32 %v2914_v9, %v1662_v42  ;;  %v934_v13 = vadd.f32 %v902_v21, %v830_v32  ;;  %v1214_v46 = vmul.f32 %v2801_v50, %v3097_v22  ;;  %v1318_v5 = vmul.f32 %v2857_v28, %v3091_v3 }
 0x130   : > { %1847 = vrot.lane.b32.xlu1 %v1764_v18, %s2508_s18  ;;  %v1439_v61 = vadd.f32 %v1407_v8, %v1334_v20  ;;  %v1423_v14 = vmul.f32 %v2766_v24, %v3201_v11  ;;  %v1527_v43 = vmul.f32 %v2771_v25, %v3203_v53  ;;  %v1231_v2 = vadd.f32 %v1199_v35, %v1127_v1 }
 0x131   : > { %v1733_v58 = vmax.f32 %v1701_v30, 0.0  ;;  %v1038_v62 = vadd.f32 %v1006_v54, %v934_v13  ;;  %v1631_v10 = vmul.f32 %v2818_v59, %v3196_v6  ;;  %v831_v57 = vmul.f32 %v2697_v27, %v3011_v31  ;;  %v3226_v54 = vld [vmem:[#allocation2 + $0x138] sm:$0xff] }
 0x132   : > { %v1543_v56 = vadd.f32 %v1511_v7, %v1439_v61  ;;  %v903_v8 = vmul.f32 %v2702_v29, %v3013_v23  ;;  %v1007_v42 = vmul.f32 %v2715_v47, %v3015_v55  ;;  %v1335_v32 = vadd.f32 %v1303_v17, %v1231_v2  ;;  %v3228_v23 = vld [vmem:[#allocation2 + $0x139] sm:$0xff] }
 0x133   : > { %v1765_v51 = vmin.f32 %v1733_v58, 6.0  ;;  %v1142_v21 = vadd.f32 %v1110_v16, %v1038_v62  ;;  %v1111_v35 = vmul.f32 %v2788_v40, %v3119_v12  ;;  %v1215_v7 = vmul.f32 %v2801_v50, %v3129_v41  ;;  %v3235_v30 = vld [vmem:[#allocation2 + $0x13a] sm:$0xff] }
 0x134   : > { %v1647_v18 = vadd.f32 %v1615_v63, %v1543_v56  ;;  %v935_v20 = vadd.f32 %v903_v8, %v831_v57  ;;  %v1319_v31 = vmul.f32 %v2857_v28, %v3121_v33  ;;  %v1440_v55 = vadd.f32 %v1408_v26, %v1335_v32 }
 0x135   : > { %1849 = vrot.lane.b32.xlu0 %v1765_v51, %s2508_s18  ;;  %v1246_v17 = vadd.f32 %v1214_v46, %v1142_v21  ;;  %v1424_v16 = vmul.f32 %v2766_v24, %v3226_v54  ;;  %v1528_v63 = vmul.f32 %v2771_v25, %v3228_v23  ;;  %v1632_v61 = vmul.f32 %v2818_v59, %v3235_v30 }
 0x136   : > { %v1686_v1 = vadd.f32 %v2914_v9, %v1647_v18  ;;  %v1039_v13 = vadd.f32 %v1007_v42, %v935_v20  ;;  %v816_v58 = vmul.f32 %v2697_v27, %v3030_v4  ;;  %v1544_v2 = vadd.f32 %v1512_v36, %v1440_v55  ;;  %v3252_v36 = vld [vmem:[#allocation2 + $0x80] sm:$0xff] }
 0x137   : > { %v1350_v26 = vadd.f32 %v1318_v5, %v1246_v17  ;;  %v888_v46 = vmul.f32 %v2702_v29, %v3032_v37  ;;  %v992_v62 = vmul.f32 %v2715_v47, %v3034_v45  ;;  %v1096_v8 = vmul.f32 %v2788_v40, %v3142_v49  ;;  %v3254_v37 = vld [vmem:[#allocation2 + $0x81] sm:$0xff] }
 0x138   : > { %v1718_v56 = vmax.f32 %v1686_v1, 0.0  ;;  %v1143_v57 = vadd.f32 %v1111_v35, %v1039_v13  ;;  %v1200_v42 = vmul.f32 %v2801_v50, %v3144_v38  ;;  %v1648_v51 = vadd.f32 %v1616_v44, %v1544_v2  ;;  %v3260_v20 = vld [vmem:[#allocation2 + $0x82] sm:$0xff]  ;;  %v3272_v2 = vld [vmem:[#allocation2 + $0x90] sm:$0xff] }
 0x139   : > { %v1455_v32 = vadd.f32 %v1423_v14, %v1350_v26  ;;  %v920_v21 = vadd.f32 %v888_v46, %v816_v58  ;;  %v1304_v4 = vmul.f32 %v2857_v28, %v3146_v19  ;;  %v1409_v35 = vmul.f32 %v2766_v24, %v3252_v36 }
 0x13a   : > { %v1750_v5 = vmin.f32 %v1718_v56, 6.0  ;;  %v1247_v45 = vadd.f32 %v1215_v7, %v1143_v57  ;;  %v1513_v18 = vmul.f32 %v2771_v25, %v3254_v37  ;;  %v1687_v44 = vadd.f32 %v2914_v9, %v1648_v51  ;;  %v3276_v56 = vld [vmem:[#allocation2 + $0x91] sm:$0xff] }
 0x13b   : > { %v1559_v14 = vadd.f32 %v1527_v43, %v1455_v32  ;;  %v1024_v55 = vadd.f32 %v992_v62, %v920_v21  ;;  %v1617_v17 = vmul.f32 %v2818_v59, %v3260_v20  ;;  %v817_v7 = vmul.f32 %v2697_v27, %v3060_v39 }
 0x13c   : > { %1819 = vrot.lane.b32.xlu1 %v1750_v5, %s2508_s18  ;;  %v1351_v1 = vadd.f32 %v1319_v31, %v1247_v45  ;;  %v889_v13 = vmul.f32 %v2702_v29, %v3069_v34  ;;  %v993_v58 = vmul.f32 %v2715_v47, %v3062_v52  ;;  %v1719_v26 = vmax.f32 %v1687_v44, 0.0  ;;  %v3278_v31 = vld [vmem:[#allocation2 + $0x92] sm:$0xff] }
 0x13d   : > { %v1663_v43 = vadd.f32 %v1631_v10, %v1559_v14  ;;  %v1128_v46 = vadd.f32 %v1096_v8, %v1024_v55  ;;  %v1097_v62 = vmul.f32 %v2788_v40, %v3173_v60  ;;  %v1201_v34 = vmul.f32 %v2801_v50, %v3179_v15 }
 0x13e   : > { %v1456_v57 = vadd.f32 %v1424_v16, %v1351_v1  ;;  %v921_v39 = vadd.f32 %v889_v13, %v817_v7  ;;  %v1305_v52 = vmul.f32 %v2857_v28, %v3181_v48  ;;  %v1751_v51 = vmin.f32 %v1719_v26, 6.0 }
 0x13f   : > { %v1702_v32 = vadd.f32 %v2914_v9, %v1663_v43  ;;  %v1232_v10 = vadd.f32 %v1200_v42, %v1128_v46  ;;  %v1410_v8 = vmul.f32 %v2766_v24, %v3272_v2  ;;  %v1514_v45 = vmul.f32 %v2771_v25, %v3276_v56  ;;  %v3302_v46 = vld [vmem:[#allocation2 + $0x140] sm:$0xff] }
 0x140   : > { %v1560_v21 = vadd.f32 %v1528_v63, %v1456_v57  ;;  %v1025_v5 = vadd.f32 %v993_v58, %v921_v39  ;;  %v1618_v16 = vmul.f32 %v2818_v59, %v3278_v31  ;;  %1821 = vrot.lane.b32.xlu0 %v1751_v51, %s2508_s18  ;;  %v832_v55 = vmul.f32 %v2697_v27, %v3095_v0 }
 0x141   : > { %v1734_v44 = vmax.f32 %v1702_v32, 0.0  ;;  %v1336_v14 = vadd.f32 %v1304_v4, %v1232_v10  ;;  %v904_v42 = vmul.f32 %v2702_v29, %v3097_v22  ;;  %v1008_v63 = vmul.f32 %v2715_v47, %v3091_v3  ;;  %v3309_v22 = vld [vmem:[#allocation2 + $0x141] sm:$0xff]  ;;  %v3321_v32 = vld [vmem:[%s3965_s3] ss:$0 sm:$0xff] }
 0x142   : > { %v1664_v1 = vadd.f32 %v1632_v61, %v1560_v21  ;;  %v1129_v7 = vadd.f32 %v1097_v62, %v1025_v5  ;;  %v1112_v13 = vmul.f32 %v2788_v40, %v3201_v11  ;;  %v1216_v4 = vmul.f32 %v2801_v50, %v3203_v53  ;;  %v3311_v61 = vld [vmem:[#allocation2 + $0x142] sm:$0xff]  ;;  %v3332_v5 = vld [vmem:[#allocation2 + $0x150] sm:$0xff] }
 0x143   : > { %v1766_v58 = vmin.f32 %v1734_v44, 6.0  ;;  %v1441_v26 = vadd.f32 %v1409_v35, %v1336_v14  ;;  %v936_v43 = vadd.f32 %v904_v42, %v832_v55  ;;  %v1320_v29 = vmul.f32 %v2857_v28, %v3196_v6  ;;  %v3338_v42 = vld [vmem:[#allocation2 + $0x151] sm:$0xff] }
 0x144   : > { %v1703_v27 = vadd.f32 %v2914_v9, %v1664_v1  ;;  %v1233_v0 = vadd.f32 %v1201_v34, %v1129_v7  ;;  %v1425_v3 = vmul.f32 %v2766_v24, %v3302_v46  ;;  %v1529_v57 = vmul.f32 %v2771_v25, %v3309_v22 }
 0x145   : > { %1851 = vrot.lane.b32.xlu1 %v1766_v58, %s2508_s18  ;;  %v1545_v35 = vadd.f32 %v1513_v18, %v1441_v26  ;;  %v1040_v62 = vadd.f32 %v1008_v63, %v936_v43  ;;  %v1633_v39 = vmul.f32 %v2818_v59, %v3311_v61  ;;  %v833_v10 = vmul.f32 %v3321_v32, %v3119_v12  ;;  %v3328_v18 = vld [vmem:[%s3965_s3 + $0x1] ss:$0 sm:$0xff]  ;;  %v3340_v12 = vld [vmem:[#allocation2 + $0x152] sm:$0xff] }
 0x146   : > { %v1735_v34 = vmax.f32 %v1703_v27, 0.0  ;;  %v1337_v51 = vadd.f32 %v1305_v52, %v1233_v0  ;;  %v905_v21 = vmul.f32 %v3328_v18, %v3129_v41  ;;  %v1009_v14 = vmul.f32 %v2715_v47, %v3121_v33 }
 0x147   : > { %v1649_v44 = vadd.f32 %v1617_v17, %v1545_v35  ;;  %v1144_v52 = vadd.f32 %v1112_v13, %v1040_v62  ;;  %v1113_v55 = vmul.f32 %v2788_v40, %v3226_v54  ;;  %v1217_v41 = vmul.f32 %v2801_v50, %v3228_v23 }
 0x148   : > { %v1767_v1 = vmin.f32 %v1735_v34, 6.0  ;;  %v1442_v7 = vadd.f32 %v1410_v8, %v1337_v51  ;;  %v937_v63 = vadd.f32 %v905_v21, %v833_v10  ;;  %v1321_v13 = vmul.f32 %v2857_v28, %v3235_v30 }
 0x149   : > { %v1688_v58 = vadd.f32 %v2914_v9, %v1649_v44  ;;  %v1248_v17 = vadd.f32 %v1216_v4, %v1144_v52  ;;  %v1426_v47 = vmul.f32 %v2766_v24, %v3332_v5  ;;  %v1530_v8 = vmul.f32 %v2771_v25, %v3338_v42 }
 0x14a   : > { %1853 = vrot.lane.b32.xlu0 %v1767_v1, %s2508_s18  ;;  %v1546_v33 = vadd.f32 %v1514_v45, %v1442_v7  ;;  %v1041_v26 = vadd.f32 %v1009_v14, %v937_v63  ;;  %v1634_v43 = vmul.f32 %v2818_v59, %v3340_v12  ;;  %v818_v4 = vmul.f32 %v3321_v32, %v3142_v49  ;;  %v3361_v45 = vld [vmem:[%s3965_s3 + $0x2] ss:$0 sm:$0xff]  ;;  %v3378_v1 = vld [vmem:[#allocation2 + $0x99] sm:$0xff] }
 0x14b   : > { %v1720_v27 = vmax.f32 %v1688_v58, 0.0  ;;  %v1352_v0 = vadd.f32 %v1320_v29, %v1248_v17  ;;  %v890_v35 = vmul.f32 %v3328_v18, %v3144_v38  ;;  %v994_v51 = vmul.f32 %v3361_v45, %v3146_v19  ;;  %v3367_v29 = vld [vmem:[#allocation2 + $0x9a] sm:$0xff] }
 0x14c   : > { %v1650_v62 = vadd.f32 %v1618_v16, %v1546_v33  ;;  %v1145_v34 = vadd.f32 %v1113_v55, %v1041_v26  ;;  %v1098_v10 = vmul.f32 %v2788_v40, %v3252_v36  ;;  %v1202_v38 = vmul.f32 %v2801_v50, %v3254_v37  ;;  %v3371_v16 = vld [vmem:[#allocation2 + $0x98] sm:$0xff] }
 0x14d   : > { %v1752_v21 = vmin.f32 %v1720_v27, 6.0  ;;  %v1457_v49 = vadd.f32 %v1425_v3, %v1352_v0  ;;  %v922_v44 = vadd.f32 %v890_v35, %v818_v4  ;;  %v1306_v55 = vmul.f32 %v2857_v28, %v3260_v20 }
 0x14e   : > { %v1689_v52 = vadd.f32 %v2914_v9, %v1650_v62  ;;  %v1249_v14 = vadd.f32 %v1217_v41, %v1145_v34  ;;  %v1411_v19 = vmul.f32 %v2766_v24, %v3371_v16  ;;  %v1515_v63 = vmul.f32 %v2771_v25, %v3378_v1  ;;  %v3395_v62 = vld [vmem:[#allocation2 + $0xa8] sm:$0xff] }
 0x14f   : > { %1823 = vrot.lane.b32.xlu1 %v1752_v21, %s2508_s18  ;;  %v1561_v3 = vadd.f32 %v1529_v57, %v1457_v49  ;;  %v1026_v7 = vadd.f32 %v994_v51, %v922_v44  ;;  %v1619_v58 = vmul.f32 %v2818_v59, %v3367_v29  ;;  %v819_v33 = vmul.f32 %v3321_v32, %v3173_v60 }
 0x150   : > { %v1721_v17 = vmax.f32 %v1689_v52, 0.0  ;;  %v1353_v41 = vadd.f32 %v1321_v13, %v1249_v14  ;;  %v891_v24 = vmul.f32 %v3328_v18, %v3179_v15  ;;  %v995_v57 = vmul.f32 %v3361_v45, %v3181_v48  ;;  %v3403_v48 = vld [vmem:[%s3965_s3 + $0x6] ss:$0 sm:$0xff]  ;;  %v3425_v14 = vld [vmem:[#allocation2 + $0x158] sm:$0xff] }
 0x151   : > { %v1665_v26 = vadd.f32 %v1633_v39, %v1561_v3  ;;  %v1130_v27 = vadd.f32 %v1098_v10, %v1026_v7  ;;  %v1099_v0 = vmul.f32 %v2788_v40, %v3272_v2  ;;  %v1203_v13 = vmul.f32 %v2801_v50, %v3276_v56  ;;  %v3407_v39 = vld [vmem:[#allocation2 + $0xa9] sm:$0xff]  ;;  %v3415_v10 = vld [vmem:[%s3965_s3 + $0x7] ss:$0 sm:$0xff] }
 0x152   : > { %v1753_v25 = vmin.f32 %v1721_v17, 6.0  ;;  %v1458_v4 = vadd.f32 %v1426_v47, %v1353_v41  ;;  %v923_v35 = vadd.f32 %v891_v24, %v819_v33  ;;  %v1307_v15 = vmul.f32 %v2857_v28, %v3278_v31  ;;  %v3409_v47 = vld [vmem:[#allocation2 + $0xaa] sm:$0xff]  ;;  %v3432_v41 = vld [vmem:[%s3965_s3 + $0x3] ss:$0 sm:$0xff] }
 0x153   : > { %v1704_v60 = vadd.f32 %v2914_v9, %v1665_v26  ;;  %v1234_v34 = vadd.f32 %v1202_v38, %v1130_v27  ;;  %v1412_v40 = vmul.f32 %v3403_v48, %v3395_v62  ;;  %v1516_v21 = vmul.f32 %v3415_v10, %v3407_v39 }
 0x154   : > { %1825 = vrot.lane.b32.xlu0 %v1753_v25, %s2508_s18  ;;  %v1562_v50 = vadd.f32 %v1530_v8, %v1458_v4  ;;  %v1027_v51 = vadd.f32 %v995_v57, %v923_v35  ;;  %v1620_v49 = vmul.f32 %v2818_v59, %v3409_v47  ;;  %v834_v52 = vmul.f32 %v3321_v32, %v3201_v11  ;;  %v3438_v11 = vld [vmem:[#allocation2 + $0x15a] sm:$0xff]  ;;  %v3458_v35 = vld [vmem:[%s3965_s3 + $0x8] ss:$0 sm:$0xff] }
 0x155   : > { %v1736_v44 = vmax.f32 %v1704_v60, 0.0  ;;  %v1338_v38 = vadd.f32 %v1306_v55, %v1234_v34  ;;  %v906_v8 = vmul.f32 %v3328_v18, %v3203_v53  ;;  %v1010_v17 = vmul.f32 %v3361_v45, %v3196_v6  ;;  %v3436_v55 = vld [vmem:[#allocation2 + $0x159] sm:$0xff] }
 0x156   : > { %v1666_v3 = vadd.f32 %v1634_v43, %v1562_v50  ;;  %v1131_v7 = vadd.f32 %v1099_v0, %v1027_v51  ;;  %v1114_v59 = vmul.f32 %v3432_v41, %v3302_v46  ;;  %v3443_v43 = vld [vmem:[%s3965_s3 + $0x4] ss:$0 sm:$0xff]  ;;  %v1322_v57 = vmul.f32 %v2857_v28, %v3311_v61  ;;  %v3466_v51 = vld [vmem:[#allocation2 + $0x168] sm:$0xff] }
 0x157   : > { %v1768_v53 = vmin.f32 %v1736_v44, 6.0  ;;  %v1443_v33 = vadd.f32 %v1411_v19, %v1338_v38  ;;  %v938_v24 = vadd.f32 %v906_v8, %v834_v52  ;;  %v1218_v6 = vmul.f32 %v3443_v43, %v3309_v22 }
 0x158   : > { %v1705_v26 = vadd.f32 %v2914_v9, %v1666_v3  ;;  %v1235_v27 = vadd.f32 %v1203_v13, %v1131_v7  ;;  %v1427_v0 = vmul.f32 %v3403_v48, %v3425_v14  ;;  %v1531_v4 = vmul.f32 %v3415_v10, %v3436_v55  ;;  %v3472_v3 = vld [vmem:[#allocation2 + $0x169] sm:$0xff] }
 0x159   : > { %1855 = vrot.lane.b32.xlu1 %v1768_v53, %s2508_s18  ;;  %v1547_v19 = vadd.f32 %v1515_v63, %v1443_v33  ;;  %v1042_v25 = vadd.f32 %v1010_v17, %v938_v24  ;;  %v1635_v13 = vmul.f32 %v3458_v35, %v3438_v11  ;;  %v835_v50 = vmul.f32 %v3321_v32, %v3226_v54  ;;  %v3474_v7 = vld [vmem:[#allocation2 + $0x16a] sm:$0xff] }
 0x15a   : > { %v1737_v60 = vmax.f32 %v1705_v26, 0.0  ;;  %v1339_v34 = vadd.f32 %v1307_v15, %v1235_v27  ;;  %v907_v63 = vmul.f32 %v3328_v18, %v3228_v23  ;;  %v1011_v52 = vmul.f32 %v3361_v45, %v3235_v30 }
 0x15b   : > { %v1651_v44 = vadd.f32 %v1619_v58, %v1547_v19  ;;  %v1146_v38 = vadd.f32 %v1114_v59, %v1042_v25  ;;  %v1115_v8 = vmul.f32 %v3432_v41, %v3332_v5  ;;  %v1219_v23 = vmul.f32 %v3443_v43, %v3338_v42 }
 0x15c   : > { %v1769_v15 = vmin.f32 %v1737_v60, 6.0  ;;  %v1444_v17 = vadd.f32 %v1412_v40, %v1339_v34  ;;  %v939_v54 = vadd.f32 %v907_v63, %v835_v50  ;;  %v1323_v59 = vmul.f32 %v2857_v28, %v3340_v12 }
 0x15d   : > { %v1690_v53 = vadd.f32 %v2914_v9, %v1651_v44  ;;  %v1250_v58 = vadd.f32 %v1218_v6, %v1146_v38  ;;  %v1428_v30 = vmul.f32 %v3403_v48, %v3466_v51  ;;  %v1532_v40 = vmul.f32 %v3415_v10, %v3472_v3  ;;  %v3498_v38 = vld [vmem:[#allocation2 + $0xb0] sm:$0xff] }
 0x15e   : > { %1857 = vrot.lane.b32.xlu0 %v1769_v15, %s2508_s18  ;;  %v1548_v33 = vadd.f32 %v1516_v21, %v1444_v17  ;;  %v1043_v24 = vadd.f32 %v1011_v52, %v939_v54  ;;  %v1636_v26 = vmul.f32 %v3458_v35, %v3474_v7  ;;  %v820_v6 = vmul.f32 %v3321_v32, %v3252_v36 }
 0x15f   : > { %v1722_v27 = vmax.f32 %v1690_v53, 0.0  ;;  %v1354_v19 = vadd.f32 %v1322_v57, %v1250_v58  ;;  %v892_v28 = vmul.f32 %v3328_v18, %v3254_v37  ;;  %v996_v21 = vmul.f32 %v3361_v45, %v3260_v20  ;;  %4038 = vst [vmem:[#allocation38_spill] sm:$0xff] %v3498_v38  ;;  %v3504_v37 = vld [vmem:[%s3965_s3 + $0x5] ss:$0 sm:$0xff] }
 0x160   : > { %v1652_v25 = vadd.f32 %v1620_v49, %v1548_v33  ;;  %v1147_v60 = vadd.f32 %v1115_v8, %v1043_v24  ;;  %v1100_v34 = vmul.f32 %v3432_v41, %v3371_v16  ;;  %v1204_v57 = vmul.f32 %v3443_v43, %v3378_v1  ;;  %v3512_v8 = vld [vmem:[#allocation2 + $0xb2] sm:$0xff] }
 0x161   : > { %v1754_v50 = vmin.f32 %v1722_v27, 6.0  ;;  %v1459_v63 = vadd.f32 %v1427_v0, %v1354_v19  ;;  %v924_v44 = vadd.f32 %v892_v28, %v820_v6  ;;  %v1308_v20 = vmul.f32 %v3504_v37, %v3367_v29  ;;  %v3510_v0 = vld [vmem:[#allocation2 + $0xb1] sm:$0xff]  ;;  %4040 = vst [vmem:[#allocation40_spill] sm:$0xff] %v3512_v8 }
 0x162   : > { %v1691_v36 = vadd.f32 %v2914_v9, %v1652_v25  ;;  %v1251_v52 = vadd.f32 %v1219_v23, %v1147_v60  ;;  %v1413_v49 = vmul.f32 %v3403_v48, %v3498_v38  ;;  %4039 = vst [vmem:[#allocation39_spill] sm:$0xff] %v3510_v0  ;;  %v1517_v54 = vmul.f32 %v3415_v10, %v3510_v0 }
 0x163   : > { %1827 = vrot.lane.b32.xlu1 %v1754_v50, %s2508_s18  ;;  %v1563_v15 = vadd.f32 %v1531_v4, %v1459_v63  ;;  %v1028_v17 = vadd.f32 %v996_v21, %v924_v44  ;;  %v1621_v23 = vmul.f32 %v3458_v35, %v3512_v8  ;;  %v821_v33 = vmul.f32 %v3321_v32, %v3272_v2  ;;  %v3529_v21 = vld [vmem:[#allocation2 + $0xc0] sm:$0xff] }
 0x164   : > { %v1723_v53 = vmax.f32 %v1691_v36, 0.0  ;;  %v1355_v58 = vadd.f32 %v1323_v59, %v1251_v52  ;;  %v893_v24 = vmul.f32 %v3328_v18, %v3276_v56  ;;  %v997_v4 = vmul.f32 %v3361_v45, %v3278_v31 }
 0x165   : > { %v1667_v27 = vadd.f32 %v1635_v13, %v1563_v15  ;;  %v1132_v19 = vadd.f32 %v1100_v34, %v1028_v17  ;;  %v1101_v6 = vmul.f32 %v3432_v41, %v3395_v62  ;;  %v1205_v59 = vmul.f32 %v3443_v43, %v3407_v39  ;;  %v3536_v13 = vld [vmem:[#allocation2 + $0xc1] sm:$0xff]  ;;  %v3549_v17 = vld [vmem:[#allocation2 + $0x170] sm:$0xff] }
 0x166   : > { %v1755_v28 = vmin.f32 %v1723_v53, 6.0  ;;  %v1460_v25 = vadd.f32 %v1428_v30, %v1355_v58  ;;  %v925_v60 = vadd.f32 %v893_v24, %v821_v33  ;;  %v1309_v56 = vmul.f32 %v3504_v37, %v3409_v47  ;;  %v3538_v34 = vld [vmem:[#allocation2 + $0xc2] sm:$0xff]  ;;  %v3555_v24 = vld [vmem:[#allocation2 + $0x171] sm:$0xff] }
 0x167   : > { %v1706_v2 = vadd.f32 %v2914_v9, %v1667_v27  ;;  %v1236_v50 = vadd.f32 %v1204_v57, %v1132_v19  ;;  %v1414_v31 = vmul.f32 %v3403_v48, %v3529_v21  ;;  %v1518_v44 = vmul.f32 %v3415_v10, %v3536_v13  ;;  %v3557_v27 = vld [vmem:[#allocation2 + $0x172] sm:$0xff] }
 0x168   : > { %1829 = vrot.lane.b32.xlu0 %v1755_v28, %s2508_s18  ;;  %v1564_v30 = vadd.f32 %v1532_v40, %v1460_v25  ;;  %v1029_v63 = vadd.f32 %v997_v4, %v925_v60  ;;  %v1622_v9 = vmul.f32 %v3458_v35, %v3538_v34  ;;  %v836_v52 = vmul.f32 %v3321_v32, %v3302_v46 }
 0x169   : > { %v1738_v57 = vmax.f32 %v1706_v2, 0.0  ;;  %v1340_v36 = vadd.f32 %v1308_v20, %v1236_v50  ;;  %v908_v15 = vmul.f32 %v3328_v18, %v3309_v22  ;;  %v1012_v40 = vmul.f32 %v3361_v45, %v3311_v61 }
 0x16a   : > { %v1668_v53 = vadd.f32 %v1636_v26, %v1564_v30  ;;  %v1133_v58 = vadd.f32 %v1101_v6, %v1029_v63  ;;  %v1116_v33 = vmul.f32 %v3432_v41, %v3425_v14  ;;  %v1220_v22 = vmul.f32 %v3443_v43, %v3436_v55  ;;  %v3564_v26 = vld [vmem:[%s3966_s4] ss:$0 sm:$0xff] }
 0x16b   : > { %v1770_v20 = vmin.f32 %v1738_v57, 6.0  ;;  %v1445_v19 = vadd.f32 %v1413_v49, %v1340_v36  ;;  %v940_v46 = vadd.f32 %v908_v15, %v836_v52  ;;  %v1324_v6 = vmul.f32 %v3504_v37, %v3438_v11  ;;  %v3580_v57 = vld [vmem:[#allocation2 + $0x180] sm:$0xff] }
 0x16c   : > { %v1707_v61 = vadd.f32 %v3564_v26, %v1668_v53  ;;  %v1237_v4 = vadd.f32 %v1205_v59, %v1133_v58  ;;  %v1429_v28 = vmul.f32 %v3403_v48, %v3549_v17  ;;  %v1533_v60 = vmul.f32 %v3415_v10, %v3555_v24  ;;  %v3586_v53 = vld [vmem:[#allocation2 + $0x181] sm:$0xff] }
 0x16d   : > { %1859 = vrot.lane.b32.xlu1 %v1770_v20, %s2508_s18  ;;  %v1549_v49 = vadd.f32 %v1517_v54, %v1445_v19  ;;  %v1044_v25 = vadd.f32 %v1012_v40, %v940_v46  ;;  %v1637_v2 = vmul.f32 %v3458_v35, %v3557_v27  ;;  %v837_v59 = vmul.f32 %v3321_v32, %v3332_v5  ;;  %v3588_v58 = vld [vmem:[#allocation2 + $0x182] sm:$0xff] }
 0x16e   : > { %v1739_v50 = vmax.f32 %v1707_v61, 0.0  ;;  %v1341_v30 = vadd.f32 %v1309_v56, %v1237_v4  ;;  %v909_v63 = vmul.f32 %v3328_v18, %v3338_v42  ;;  %v1013_v54 = vmul.f32 %v3361_v45, %v3340_v12 }
 0x16f   : > { %v1653_v36 = vadd.f32 %v1621_v23, %v1549_v49  ;;  %v1148_v52 = vadd.f32 %v1116_v33, %v1044_v25  ;;  %v1117_v15 = vmul.f32 %v3432_v41, %v3466_v51  ;;  %v1221_v42 = vmul.f32 %v3443_v43, %v3472_v3 }
 0x170   : > { %v1771_v56 = vmin.f32 %v1739_v50, 6.0  ;;  %v1446_v40 = vadd.f32 %v1414_v31, %v1341_v30  ;;  %v941_v5 = vadd.f32 %v909_v63, %v837_v59  ;;  %v1325_v33 = vmul.f32 %v3504_v37, %v3474_v7 }
 0x171   : > { %v1692_v20 = vadd.f32 %v3564_v26, %v1653_v36  ;;  %v1252_v23 = vadd.f32 %v1220_v22, %v1148_v52  ;;  %v1430_v12 = vmul.f32 %v3403_v48, %v3580_v57  ;;  %v1534_v31 = vmul.f32 %v3415_v10, %v3586_v53 }
 0x172   : > { %1861 = vrot.lane.b32.xlu0 %v1771_v56, %s2508_s18  ;;  %v1550_v19 = vadd.f32 %v1518_v44, %v1446_v40  ;;  %v1045_v46 = vadd.f32 %v1013_v54, %v941_v5  ;;  %v1638_v61 = vmul.f32 %v3458_v35, %v3588_v58  ;;  %v822_v22 = vmul.f32 %v3321_v32, %v3371_v16  ;;  %v3612_v54 = vld [vmem:[#allocation2 + $0xc8] sm:$0xff] }
 0x173   : > { %v1724_v4 = vmax.f32 %v1692_v20, 0.0  ;;  %v1356_v49 = vadd.f32 %v1324_v6, %v1252_v23  ;;  %v894_v25 = vmul.f32 %v3328_v18, %v3378_v1  ;;  %v998_v44 = vmul.f32 %v3361_v45, %v3367_v29  ;;  %v3630_v23 = vld [vmem:[#allocation2 + $0xd9] sm:$0xff] }
 0x174   : > { %v1654_v50 = vadd.f32 %v1622_v9, %v1550_v19  ;;  %v1149_v30 = vadd.f32 %v1117_v15, %v1045_v46  ;;  %v1102_v59 = vmul.f32 %v3432_v41, %v3498_v38  ;;  %v1206_v6 = vmul.f32 %v3443_v43, %v3510_v0  ;;  %v3619_v9 = vld [vmem:[#allocation2 + $0xc9] sm:$0xff] }
 0x175   : > { %v1756_v63 = vmin.f32 %v1724_v4, 6.0  ;;  %v1461_v36 = vadd.f32 %v1429_v28, %v1356_v49  ;;  %v926_v52 = vadd.f32 %v894_v25, %v822_v22  ;;  %v1310_v1 = vmul.f32 %v3504_v37, %v3512_v8  ;;  %v3621_v15 = vld [vmem:[#allocation2 + $0xca] sm:$0xff]  ;;  %v3623_v28 = vld [vmem:[#allocation2 + $0xd8] sm:$0xff] }
 0x176   : > { %v1693_v16 = vadd.f32 %v3564_v26, %v1654_v50  ;;  %v1253_v56 = vadd.f32 %v1221_v42, %v1149_v30  ;;  %v1415_v29 = vmul.f32 %v3403_v48, %v3612_v54  ;;  %v1519_v20 = vmul.f32 %v3415_v10, %v3619_v9  ;;  %v3636_v22 = vld [vmem:[#allocation2 + $0xda] sm:$0xff] }
 0x177   : > { %1831 = vrot.lane.b32.xlu1 %v1756_v63, %s2508_s18  ;;  %v1565_v40 = vadd.f32 %v1533_v60, %v1461_v36  ;;  %v1030_v5 = vadd.f32 %v998_v44, %v926_v52  ;;  %v1623_v42 = vmul.f32 %v3458_v35, %v3621_v15  ;;  %v825_v4 = vmul.f32 %v3321_v32, %v3529_v21  ;;  %v1378_v60 = vld [vmem:[#allocation2 + $0xf0] sm:$0xff] }
 0x178   : > { %v1725_v19 = vmax.f32 %v1693_v16, 0.0  ;;  %v1357_v46 = vadd.f32 %v1325_v33, %v1253_v56  ;;  %v897_v49 = vmul.f32 %v3328_v18, %v3536_v13  ;;  %v1001_v30 = vmul.f32 %v3361_v45, %v3538_v34  ;;  %v1482_v63 = vld [vmem:[#allocation2 + $0xf1] sm:$0xff] }
 0x179   : > { %v1669_v25 = vadd.f32 %v1637_v2, %v1565_v40  ;;  %v1134_v50 = vadd.f32 %v1102_v59, %v1030_v5  ;;  %v1105_v44 = vmul.f32 %v3432_v41, %v3623_v28  ;;  %v1586_v36 = vld [vmem:[#allocation2 + $0xf2] sm:$0xff]  ;;  %v1209_v56 = vmul.f32 %v3443_v43, %v3630_v23 }
 0x17a   : > { %v1757_v33 = vmin.f32 %v1725_v19, 6.0  ;;  %v1462_v52 = vadd.f32 %v1430_v12, %v1357_v46  ;;  %v929_v16 = vadd.f32 %v897_v49, %v825_v4  ;;  %v1313_v2 = vmul.f32 %v3504_v37, %v3636_v22  ;;  %v3655_v49 = vld [vmem:[#allocation2 + $0x188] sm:$0xff] }
 0x17b   : > { %v1708_v8 = vadd.f32 %v3564_v26, %v1669_v25  ;;  %v1238_v0 = vadd.f32 %v1206_v6, %v1134_v50  ;;  %v1418_v59 = vmul.f32 %v3403_v48, %v1378_v60  ;;  %v1522_v38 = vmul.f32 %v3415_v10, %v1482_v63 }
 0x17c   : > { %1833 = vrot.lane.b32.xlu0 %v1757_v33, %s2508_s18  ;;  %v1566_v40 = vadd.f32 %v1534_v31, %v1462_v52  ;;  %v1033_v5 = vadd.f32 %v1001_v30, %v929_v16  ;;  %v1626_v12 = vmul.f32 %v3458_v35, %v1586_v36  ;;  %v838_v4 = vmul.f32 %v3321_v32, %v3425_v14  ;;  %v3661_v30 = vld [vmem:[#allocation2 + $0x189] sm:$0xff] }
 0x17d   : > { %v1740_v19 = vmax.f32 %v1708_v8, 0.0  ;;  %v1342_v46 = vadd.f32 %v1310_v1, %v1238_v0  ;;  %v910_v6 = vmul.f32 %v3328_v18, %v3436_v55  ;;  %v1014_v31 = vmul.f32 %v3361_v45, %v3438_v11  ;;  %v3663_v8 = vld [vmem:[#allocation2 + $0x18a] sm:$0xff] }
 0x17e   : > { %v1670_v25 = vadd.f32 %v1638_v61, %v1566_v40  ;;  %v1137_v60 = vadd.f32 %v1105_v44, %v1033_v5  ;;  %v1118_v50 = vmul.f32 %v3432_v41, %v3549_v17  ;;  %v1222_v55 = vmul.f32 %v3443_v43, %v3555_v24 }
 0x17f   : > { %v1772_v0 = vmin.f32 %v1740_v19, 6.0  ;;  %v1447_v1 = vadd.f32 %v1415_v29, %v1342_v46  ;;  %v942_v14 = vadd.f32 %v910_v6, %v838_v4  ;;  %v1326_v44 = vmul.f32 %v3504_v37, %v3557_v27 }
 0x180   : > { %v1709_v63 = vadd.f32 %v3564_v26, %v1670_v25  ;;  %v1241_v61 = vadd.f32 %v1209_v56, %v1137_v60  ;;  %v1431_v11 = vmul.f32 %v3403_v48, %v3655_v49  ;;  %v1535_v29 = vmul.f32 %v3415_v10, %v3661_v30 }
 0x181   : > { %1863 = vrot.lane.b32.xlu1 %v1772_v0, %s2508_s18  ;;  %v1551_v36 = vadd.f32 %v1519_v20, %v1447_v1  ;;  %v1046_v33 = vadd.f32 %v1014_v31, %v942_v14  ;;  %v1639_v52 = vmul.f32 %v3458_v35, %v3663_v8  ;;  %v823_v56 = vmul.f32 %v3321_v32, %v3395_v62  ;;  %v3699_v0 = vld [vmem:[#allocation2 + $0xe1] sm:$0xff] }
 0x182   : > { %v1741_v16 = vmax.f32 %v1709_v63, 0.0  ;;  %v1345_v40 = vadd.f32 %v1313_v2, %v1241_v61  ;;  %v895_v5 = vmul.f32 %v3328_v18, %v3407_v39  ;;  %v999_v20 = vmul.f32 %v3361_v45, %v3409_v47 }
 0x183   : > { %v1655_v19 = vadd.f32 %v1623_v42, %v1551_v36  ;;  %v1150_v46 = vadd.f32 %v1118_v50, %v1046_v33  ;;  %v1103_v4 = vmul.f32 %v3432_v41, %v3529_v21  ;;  %v1207_v2 = vmul.f32 %v3443_v43, %v3536_v13  ;;  %v3692_v50 = vld [vmem:[#allocation2 + $0xe0] sm:$0xff] }
 0x184   : > { %v1773_v6 = vmin.f32 %v1741_v16, 6.0  ;;  %v1450_v25 = vadd.f32 %v1418_v59, %v1345_v40  ;;  %v927_v60 = vadd.f32 %v895_v5, %v823_v56  ;;  %v1311_v39 = vmul.f32 %v3504_v37, %v3538_v34  ;;  %v1483_v36 = vld [vmem:[#allocation2 + $0xf9] sm:$0xff] }
 0x185   : > { %v1694_v31 = vadd.f32 %v3564_v26, %v1655_v19  ;;  %v1254_v62 = vadd.f32 %v1222_v55, %v1150_v46  ;;  %v1416_v42 = vmul.f32 %v3403_v48, %v3623_v28  ;;  %v1520_v59 = vmul.f32 %v3415_v10, %v3630_v23  ;;  %v3705_v55 = vld [vmem:[#allocation2 + $0xe2] sm:$0xff]  ;;  %v1587_v33 = vld [vmem:[#allocation2 + $0xfa] sm:$0xff] }
 0x186   : > { %1865 = vrot.lane.b32.xlu0 %v1773_v6, %s2508_s18  ;;  %v1554_v47 = vadd.f32 %v1522_v38, %v1450_v25  ;;  %v1031_v21 = vadd.f32 %v999_v20, %v927_v60  ;;  %v1624_v13 = vmul.f32 %v3458_v35, %v3636_v22  ;;  %v826_v34 = vmul.f32 %v3321_v32, %v3612_v54  ;;  %v1379_v38 = vld [vmem:[#allocation2 + $0xf8] sm:$0xff] }
 0x187   : > { %v1726_v1 = vmax.f32 %v1694_v31, 0.0  ;;  %v1358_v14 = vadd.f32 %v1326_v44, %v1254_v62  ;;  %v898_v28 = vmul.f32 %v3328_v18, %v3619_v9  ;;  %v1002_v23 = vmul.f32 %v3361_v45, %v3621_v15  ;;  %v1392_v62 = vld [vmem:[#allocation2 + $0x198] sm:$0xff] }
 0x188   : > { %v1658_v63 = vadd.f32 %v1626_v12, %v1554_v47  ;;  %v1135_v61 = vadd.f32 %v1103_v4, %v1031_v21  ;;  %v1106_v22 = vmul.f32 %v3432_v41, %v3692_v50  ;;  %v1210_v56 = vmul.f32 %v3443_v43, %v3699_v0  ;;  %v3724_v47 = vpop.permute.xlu0 %1809 }
 0x189   : > { %v1758_v44 = vmin.f32 %v1726_v1, 6.0  ;;  %v1463_v16 = vadd.f32 %v1431_v11, %v1358_v14  ;;  %v930_v40 = vadd.f32 %v898_v28, %v826_v34  ;;  %v1314_v12 = vmul.f32 %v3504_v37, %v3705_v55  ;;  %v1496_v34 = vld [vmem:[#allocation2 + $0x199] sm:$0xff] }
 0x18a   : > { %v1697_v5 = vadd.f32 %v3564_v26, %v1658_v63  ;;  %v1239_v19 = vadd.f32 %v1207_v2, %v1135_v61  ;;  %v1419_v46 = vmul.f32 %v3403_v48, %v1379_v38  ;;  %v1523_v6 = vmul.f32 %v3415_v10, %v1483_v36  ;;  %v1600_v28 = vld [vmem:[#allocation2 + $0x19a] sm:$0xff] }
 0x18b   : > { %1835 = vrot.lane.b32.xlu1 %v1758_v44, %s2508_s18  ;;  %v1567_v20 = vadd.f32 %v1535_v29, %v1463_v16  ;;  %v1034_v4 = vadd.f32 %v1002_v23, %v930_v40  ;;  %v1627_v11 = vmul.f32 %v3458_v35, %v1587_v33  ;;  %v839_v31 = vmul.f32 %v3321_v32, %v3466_v51  ;;  %v4041_v44 = vld [vmem:[#allocation38_spill] sm:$0xff]  ;;  %v4042_v16 = vld [vmem:[#allocation39_spill] sm:$0xff] }
 0x18c   : > { %v1729_v25 = vmax.f32 %v1697_v5, 0.0  ;;  %v1343_v60 = vadd.f32 %v1311_v39, %v1239_v19  ;;  %v911_v2 = vmul.f32 %v3328_v18, %v3472_v3  ;;  %v1015_v29 = vmul.f32 %v3361_v45, %v3474_v7  ;;  %v4043_v5 = vld [vmem:[#allocation40_spill] sm:$0xff] }
 0x18d   : > { %v1671_v21 = vadd.f32 %v1639_v52, %v1567_v20  ;;  %v1138_v1 = vadd.f32 %v1106_v22, %v1034_v4  ;;  %v1119_v14 = vmul.f32 %v3432_v41, %v3580_v57  ;;  %v1223_v51 = vmul.f32 %v3443_v43, %v3586_v53  ;;  %v1812_v20 = vpop.permute.xlu0 %1811 }
 0x18e   : > { %v1761_v39 = vmin.f32 %v1729_v25, 6.0  ;;  %v1448_v38 = vadd.f32 %v1416_v42, %v1343_v60  ;;  %v943_v63 = vadd.f32 %v911_v2, %v839_v31  ;;  %v1327_v52 = vmul.f32 %v3504_v37, %v3588_v58 }
 0x18f   : > { %v1710_v3 = vadd.f32 %v3564_v26, %v1671_v21  ;;  %v1242_v61 = vadd.f32 %v1210_v56, %v1138_v1  ;;  %v1432_v23 = vmul.f32 %v3403_v48, %v1392_v62  ;;  %v1536_v22 = vmul.f32 %v3415_v10, %v1496_v34 }
 0x190   : > { %1841 = vrot.lane.b32.xlu0 %v1761_v39, %s2508_s18  ;;  %v1552_v7 = vadd.f32 %v1520_v59, %v1448_v38  ;;  %v1047_v57 = vadd.f32 %v1015_v29, %v943_v63  ;;  %v1640_v42 = vmul.f32 %v3458_v35, %v1600_v28  ;;  %v824_v53 = vmul.f32 %v3321_v32, %v4041_v44  ;;  %v1497_v39 = vld [vmem:[#allocation2 + $0x1a1] sm:$0xff] }
 0x191   : > { %v1742_v36 = vmax.f32 %v1710_v3, 0.0  ;;  %v1346_v33 = vadd.f32 %v1314_v12, %v1242_v61  ;;  %v896_v40 = vmul.f32 %v3328_v18, %v4042_v16  ;;  %v1000_v19 = vmul.f32 %v3361_v45, %v4043_v5  ;;  %v1601_v38 = vld [vmem:[#allocation2 + $0x1a2] sm:$0xff] }
 0x192   : > { %v1656_v56 = vadd.f32 %v1624_v13, %v1552_v7  ;;  %v1151_v58 = vadd.f32 %v1119_v14, %v1047_v57  ;;  %v1104_v59 = vmul.f32 %v3432_v41, %v3612_v54  ;;  %v1208_v12 = vmul.f32 %v3443_v43, %v3619_v9  ;;  %v4044_v57 = vld [vmem:[#allocation8_spill] sm:$0xff]  ;;  %v2297_v44 = vld [vmem:[%s3766_s15 + $0x48] sm:$0xff]  }
 0x193   : > { %v1774_v4 = vmin.f32 %v1742_v36, 6.0  ;;  %v1451_v25 = vadd.f32 %v1419_v46, %v1346_v33  ;;  %v928_v60 = vadd.f32 %v896_v40, %v824_v53  ;;  %v1312_v13 = vmul.f32 %v3504_v37, %v3621_v15  ;;  %v1814_v29 = vpop.permute.xlu1 %1813  ;;  %v4045_v33 = vld [vmem:[#allocation12_spill] sm:$0xff] }
 0x194   : > { %v1695_v31 = vadd.f32 %v3564_v26, %v1656_v56  ;;  %v1255_v2 = vadd.f32 %v1223_v51, %v1151_v58  ;;  %v1417_v62 = vmul.f32 %v3403_v48, %v3692_v50  ;;  %v1521_v46 = vmul.f32 %v3415_v10, %v3699_v0  ;;  %v1393_v0 = vld [vmem:[#allocation2 + $0x1a0] sm:$0xff] }
 0x195   : > { %1867 = vrot.lane.b32.xlu1 %v1774_v4, %s2508_s18  ;;  %v1555_v54 = vadd.f32 %v1523_v6, %v1451_v25  ;;  %v1032_v21 = vadd.f32 %v1000_v19, %v928_v60  ;;  %v3759_v9 = vmul.f32 %v3458_v35, %v3705_v55  ;;  %v840_v50 = vmul.f32 %v3321_v32, %v3549_v17  ;;  %v4046_v19 = vld [vmem:[#allocation6_spill] sm:$0xff]  ;;  %v4047_v60 = vld [vmem:[#allocation7_spill] sm:$0xff] }
 0x196   : > { %v1727_v15 = vmax.f32 %v1695_v31, 0.0  ;;  %v1359_v1 = vadd.f32 %v1327_v52, %v1255_v2  ;;  %v912_v6 = vmul.f32 %v3328_v18, %v3555_v24  ;;  %v1016_v34 = vmul.f32 %v3361_v45, %v3557_v27  ;;  %v2226_v24 = vld [vmem:[%s3766_s15] sm:$0xff]   ;;  %v1846_v51 = vpop.permute.xlu0 %1845 }
 0x197   : > { %v1659_v55 = vadd.f32 %v1627_v11, %v1555_v54  ;;  %v1136_v14 = vadd.f32 %v1104_v59, %v1032_v21  ;;  %v1120_v28 = vmul.f32 %v3432_v41, %v3655_v49  ;;  %v1224_v18 = vmul.f32 %v3443_v43, %v3661_v30  ;;  %v2289_v30 = vld [vmem:[%s3766_s15 + $0x8] sm:$0xff]  }
 0x198   : > { %v1759_v63 = vmin.f32 %v1727_v15, 6.0  ;;  %v1464_v32 = vadd.f32 %v1432_v23, %v1359_v1  ;;  %v944_v17 = vadd.f32 %v912_v6, %v840_v50  ;;  %v1328_v45 = vmul.f32 %v3504_v37, %v3663_v8  ;;  %v4049_v1 = vld [vmem:[#allocation16_spill] sm:$0xff] }
 0x199   : > { %v1698_v11 = vadd.f32 %v3564_v26, %v1659_v55  ;;  %v1240_v3 = vadd.f32 %v1208_v12, %v1136_v14  ;;  %v1433_v27 = vmul.f32 %v3403_v48, %v1393_v0  ;;  %v1537_v61 = vmul.f32 %v3415_v10, %v1497_v39  ;;  %v1816_v53 = vpop.permute.xlu1 %1815 }
 0x19a   : > { %1837 = vrot.lane.b32.xlu0 %v1759_v63, %s2508_s18  ;;  %v1568_v41 = vadd.f32 %v1536_v22, %v1464_v32  ;;  %v1048_v49 = vadd.f32 %v1016_v34, %v944_v17  ;;  %v1641_v43 = vmul.f32 %v3458_v35, %v1601_v38  ;;  %v2227_v7 = vunpack.c.l.bf16 %v2226_v24  ;;  %v2298_v34 = vld [vmem:[%s3766_s15 + $0x50] sm:$0xff]  }
 0x19b   : > { %v1730_v52 = vmax.f32 %v1698_v11, 0.0  ;;  %v1344_v23 = vadd.f32 %v1312_v13, %v1240_v3  ;;  %v1905_v48 = vsel %vm271_vm0, %v4044_v57, %v3724_v47  ;;  %v2228_v36 = vunpack.c.h.bf16 %v2226_v24  ;;  %v2290_v47 = vld [vmem:[%s3766_s15 + $0x10] sm:$0xff]  }
 0x19c   : > { %v1672_v37 = vadd.f32 %v1640_v42, %v1568_v41  ;;  %v1152_v8 = vadd.f32 %v1120_v28, %v1048_v49  ;;  %v1906_v22 = vsel %vm271_vm0, %v4045_v33, %v1812_v20  ;;  %v2001_v35 = vadd.f32 %v2227_v7, %v1905_v48 }
 0x19d   : > { %v1762_v10 = vmin.f32 %v1730_v52, 6.0  ;;  %v1449_v16 = vadd.f32 %v1417_v62, %v1344_v23  ;;  %v2231_v40 = vunpack.c.l.bf16 %v2289_v30  ;;  %v2002_v5 = vadd.f32 %v2228_v36, %v1906_v22  ;;  %v1818_v42 = vpop.permute.xlu0 %1817  ;;  %v4048_v62 = vld [vmem:[#allocation10_spill] sm:$0xff]  ;;  %v2291_v52 = vld [vmem:[%s3766_s15 + $0x18] sm:$0xff]   ;;  %v4052_v23 = vld [vmem:[#allocation20_spill] sm:$0xff] }
 0x19e   : > { %v1711_v56 = vadd.f32 %v3564_v26, %v1672_v37  ;;  %v1256_v58 = vadd.f32 %v1224_v18, %v1152_v8  ;;  %v1907_v59 = vsel %vm271_vm0, %v4046_v19, %v1814_v29  ;;  %2033 = vst [vmem:[%s3801_s16] sm:$0xff] %v2001_v35  ;;  %v2263_v25 = vunpack.c.l.bf16 %v2297_v44  ;;  %v4053_v37 = vld [vmem:[#allocation14_spill] sm:$0xff] }
 0x19f   : > { %1843 = vrot.lane.b32.xlu1 %v1762_v10, %s2508_s18  ;;  %v1553_v4 = vadd.f32 %v1521_v46, %v1449_v16  ;;  %v2003_v20 = vadd.f32 %v2231_v40, %v1907_v59  ;;  %v1923_v12 = vsel %vm271_vm0, %v4047_v60, %v1846_v51  ;;  %2034 = vst [vmem:[%s3801_s16 + $0x8] sm:$0xff] %v2002_v5  ;;  %v2232_v13 = vunpack.c.h.bf16 %v2289_v30 }
 0x1a0   : > { %v1743_v31 = vmax.f32 %v1711_v56, 0.0  ;;  %v1360_v2 = vadd.f32 %v1328_v45, %v1256_v58  ;;  %v1908_v54 = vsel %vm271_vm0, %v4048_v62, %v1816_v53  ;;  %v2019_v46 = vadd.f32 %v2263_v25, %v1923_v12  ;;  %v4051_v45 = vld [vmem:[#allocation17_spill] sm:$0xff]  ;;  %v4055_v56 = vld [vmem:[#allocation15_spill] sm:$0xff]  ;;  %v4057_v12 = vld [vmem:[#allocation24_spill] sm:$0xff] }
 0x1a1   : > { %v1657_v21 = vadd.f32 %v3759_v9, %v1553_v4  ;;  %2035 = vst [vmem:[%s3801_s16 + $0x10] sm:$0xff] %v2003_v20  ;;  %v2235_v15 = vunpack.c.l.bf16 %v2290_v47  ;;  %v1909_v50 = vsel %vm271_vm0, %v4049_v1, %v1818_v42  ;;  %v2004_v29 = vadd.f32 %v2232_v13, %v1908_v54  ;;  %v4050_v9 = vld [vmem:[#allocation11_spill] sm:$0xff]  ;;  %v4054_v53 = vld [vmem:[#allocation21_spill] sm:$0xff]  ;;  %v4056_v42 = vld [vmem:[#allocation18_spill] sm:$0xff] }
 0x1a2   : > { %v1775_v6 = vmin.f32 %v1743_v31, 6.0  ;;  %v1465_v0 = vadd.f32 %v1433_v27, %v1360_v2  ;;  %v2264_v55 = vunpack.c.h.bf16 %v2297_v44  ;;  %v1848_v14 = vpop.permute.xlu1 %1847  ;;  %2051 = vst [vmem:[%s3801_s16 + $0x90] sm:$0xff] %v2019_v46  ;;  %v2267_v18 = vunpack.c.l.bf16 %v2298_v34  ;;  %v2299_v44 = vld [vmem:[%s3766_s15 + $0x58] sm:$0xff]   ;;  %v2300_v54 = vld [vmem:[%s3766_s15 + $0x60] sm:$0xff]  }
 0x1a3   : > { %v1696_v28 = vadd.f32 %v3564_v26, %v1657_v21  ;;  %v2005_v39 = vadd.f32 %v2235_v15, %v1909_v50  ;;  %v1924_v38 = vsel %vm271_vm0, %v4050_v9, %v1848_v14  ;;  %2036 = vst [vmem:[%s3801_s16 + $0x18] sm:$0xff] %v2004_v29  ;;  %v2236_v30 = vunpack.c.h.bf16 %v2290_v47  ;;  %v2292_v47 = vld [vmem:[%s3766_s15 + $0x20] sm:$0xff]   ;;  %v4058_v21 = vld [vmem:[#allocation19_spill] sm:$0xff] }
 0x1a4   : > { %1869 = vrot.lane.b32.xlu0 %v1775_v6, %s2508_s18  ;;  %v1569_v63 = vadd.f32 %v1537_v61, %v1465_v0  ;;  %v2020_v32 = vadd.f32 %v2264_v55, %v1924_v38  ;;  %v2239_v57 = vunpack.c.l.bf16 %v2291_v52  ;;  %v2268_v33 = vunpack.c.h.bf16 %v2298_v34  ;;  %v4059_v6 = vld [vmem:[#allocation25_spill] sm:$0xff] }
 0x1a5   : > { %v1728_v17 = vmax.f32 %v1696_v28, 0.0  ;;  %2037 = vst [vmem:[%s3801_s16 + $0x20] sm:$0xff] %v2005_v39  ;;  %v2271_v35 = vunpack.c.l.bf16 %v2299_v44  ;;  %v2240_v19 = vunpack.c.h.bf16 %v2291_v52  ;;  %v2243_v25 = vunpack.c.l.bf16 %v2292_v47  ;;  %v2293_v34 = vld [vmem:[%s3766_s15 + $0x28] sm:$0xff]   ;;  %v4060_v28 = vld [vmem:[#allocation28_spill] sm:$0xff] }
 0x1a6   : > { %v1673_v24 = vadd.f32 %v1641_v43, %v1569_v63  ;;  %2052 = vst [vmem:[%s3801_s16 + $0x98] sm:$0xff] %v2020_v32  ;;  %v2272_v13 = vunpack.c.h.bf16 %v2299_v44  ;;  %v2275_v1 = vunpack.c.l.bf16 %v2300_v54  ;;  %v2244_v55 = vunpack.c.h.bf16 %v2292_v47  ;;  %v4061_v32 = vld [vmem:[#allocation22_spill] sm:$0xff] }
 0x1a7   : > { %v1760_v51 = vmin.f32 %v1728_v17, 6.0  ;;  %v1850_v11 = vpop.permute.xlu0 %1849  ;;  %v2247_v38 = vunpack.c.l.bf16 %v2293_v34  ;;  %v2248_v52 = vunpack.c.h.bf16 %v2293_v34 }
 0x1a8   : > { %v1712_v3 = vadd.f32 %v3564_v26, %v1673_v24  ;;  %v1925_v27 = vsel %vm271_vm0, %v4051_v45, %v1850_v11  ;;  %v2276_v24 = vunpack.c.h.bf16 %v2300_v54  ;;  %v2301_v11 = vld [vmem:[%s3766_s15 + $0x68] sm:$0xff]  }
 0x1a9   : > { %1839 = vrot.lane.b32.xlu1 %v1760_v51, %s2508_s18  ;;  %v2021_v41 = vadd.f32 %v2267_v18, %v1925_v27  ;;  %v2280_v44 = vunpack.c.h.bf16 %v2301_v11 }
 0x1aa   : > { %v1744_v49 = vmax.f32 %v1712_v3, 0.0  ;;  %v4062_v3 = vld [vmem:[#allocation29_spill] sm:$0xff] }
 0x1ab   : > { %2053 = vst [vmem:[%s3801_s16 + $0xa0] sm:$0xff] %v2021_v41  ;;  %v2279_v41 = vunpack.c.l.bf16 %v2301_v11 }
 0x1ac   : > { %v1776_v61 = vmin.f32 %v1744_v49, 6.0 }
 0x1ae   : > { %1871 = vrot.lane.b32.xlu1 %v1776_v61, %s2508_s18  ;;  %v1820_v43 = vpop.permute.xlu1 %1819  ;;  %v4063_v61 = vld [vmem:[#allocation23_spill] sm:$0xff]  ;;  %s2224_s18 = sshll.u32 %s2568_s25, 12  ;;  %s3922_s25 = scalar_lea.sflag [#allocation4], %s257_s17 }
 0x1af   : > { %v1910_v26 = vsel %vm271_vm0, %v4052_v23, %v1820_v43  ;;  %s3915_s28 = scalar_lea.hbm %s3968_s6, %s2224_s18 }
 0x1b0   : > { %v2006_v7 = vadd.f32 %v2236_v30, %v1910_v26  ;;  %v2294_v26 = vld [vmem:[%s3766_s15 + $0x30] sm:$0xff]  }
 0x1b1   : > { %v2252_v47 = vunpack.c.h.bf16 %v2294_v26 }
 0x1b2   : > { %2038 = vst [vmem:[%s3801_s16 + $0x28] sm:$0xff] %v2006_v7  ;;  %v1822_v48 = vpop.permute.xlu0 %1821  ;;  %v4064_v7 = vld [vmem:[#allocation26_spill] sm:$0xff] }
 0x1b3   : > { %v1911_v8 = vsel %vm271_vm0, %v4053_v37, %v1822_v48  ;;  %v2251_v37 = vunpack.c.l.bf16 %v2294_v26 }
 0x1b4   : > { %v2007_v36 = vadd.f32 %v2239_v57, %v1911_v8 }
 0x1b6   : > { %2039 = vst [vmem:[%s3801_s16 + $0x30] sm:$0xff] %v2007_v36  ;;  %v4065_v36 = vld [vmem:[#allocation32_spill] sm:$0xff] }
 0x1b7   : > { %v1852_v22 = vpop.permute.xlu1 %1851 }
 0x1b8   : > { %v1926_v10 = vsel %vm271_vm0, %v4054_v53, %v1852_v22 }
 0x1b9   : > { %v2022_v16 = vadd.f32 %v2268_v33, %v1926_v10  ;;  %v2302_v10 = vld [vmem:[%s3766_s15 + $0x70] sm:$0xff]  }
 0x1ba   : > { %v2284_v54 = vunpack.c.h.bf16 %v2302_v10 }
 0x1bb   : > { %2054 = vst [vmem:[%s3801_s16 + $0xa8] sm:$0xff] %v2022_v16  ;;  %v4066_v16 = vld [vmem:[#allocation27_spill] sm:$0xff] }
 0x1bc   : > { %v1854_v40 = vpop.permute.xlu0 %1853 }
 0x1bd   : > { %v1927_v58 = vsel %vm271_vm0, %v4055_v56, %v1854_v40  ;;  %v2283_v56 = vunpack.c.l.bf16 %v2302_v10 }
 0x1be   : > { %v2023_v5 = vadd.f32 %v2271_v35, %v1927_v58 }
 0x1c0   : > { %2055 = vst [vmem:[%s3801_s16 + $0xb0] sm:$0xff] %v2023_v5  ;;  %v4067_v5 = vld [vmem:[#allocation33_spill] sm:$0xff] }
 0x1c1   : > { %v1824_v59 = vpop.permute.xlu1 %1823 }
 0x1c2   : > { %v1912_v4 = vsel %vm271_vm0, %v4056_v42, %v1824_v59 }
 0x1c3   : > { %v2008_v20 = vadd.f32 %v2240_v19, %v1912_v4  ;;  %v2296_v4 = vld [vmem:[%s3766_s15 + $0x40] sm:$0xff]  }
 0x1c4   : > { %v2260_v34 = vunpack.c.h.bf16 %v2296_v4 }
 0x1c5   : > { %2040 = vst [vmem:[%s3801_s16 + $0x38] sm:$0xff] %v2008_v20  ;;  %v4068_v20 = vld [vmem:[#allocation36_spill] sm:$0xff] }
 0x1c6   : > { %v1826_v60 = vpop.permute.xlu0 %1825 }
 0x1c7   : > { %v1913_v31 = vsel %vm271_vm0, %v4057_v12, %v1826_v60  ;;  %v2259_v12 = vunpack.c.l.bf16 %v2296_v4 }
 0x1c8   : > { %v2009_v2 = vadd.f32 %v2243_v25, %v1913_v31 }
 0x1ca   : > { %2041 = vst [vmem:[%s3801_s16 + $0x40] sm:$0xff] %v2009_v2  ;;  %v4069_v2 = vld [vmem:[#allocation9_spill] sm:$0xff] }
 0x1cb   : > { %v1856_v62 = vpop.permute.xlu1 %1855 }
 0x1cc   : > { %v1928_v46 = vsel %vm271_vm0, %v4058_v21, %v1856_v62 }
 0x1cd   : > { %v2024_v15 = vadd.f32 %v2272_v13, %v1928_v46  ;;  %v2295_v46 = vld [vmem:[%s3766_s15 + $0x38] sm:$0xff]  }
 0x1ce   : > { %v2256_v11 = vunpack.c.h.bf16 %v2295_v46 }
 0x1cf   : > { %2056 = vst [vmem:[%s3801_s16 + $0xb8] sm:$0xff] %v2024_v15  ;;  %v4070_v15 = vld [vmem:[#allocation37_spill] sm:$0xff] }
 0x1d0   : > { %v1858_v50 = vpop.permute.xlu0 %1857 }
 0x1d1   : > { %v1929_v0 = vsel %vm271_vm0, %v4059_v6, %v1858_v50  ;;  %v2255_v6 = vunpack.c.l.bf16 %v2295_v46 }
 0x1d2   : > { %v2025_v29 = vadd.f32 %v2275_v1, %v1929_v0 }
 0x1d4   : > { %2057 = vst [vmem:[%s3801_s16 + $0xc0] sm:$0xff] %v2025_v29  ;;  %v4071_v29 = vld [vmem:[#allocation30_spill] sm:$0xff] }
 0x1d5   : > { %v1828_v14 = vpop.permute.xlu1 %1827 }
 0x1d6   : > { %v1914_v39 = vsel %vm271_vm0, %v4060_v28, %v1828_v14 }
 0x1d7   : > { %v2010_v9 = vadd.f32 %v2244_v55, %v1914_v39  ;;  %v2303_v39 = vld [vmem:[%s3766_s15 + $0x78] sm:$0xff]  }
 0x1d9   : > { %2042 = vst [vmem:[%s3801_s16 + $0x48] sm:$0xff] %v2010_v9  ;;  %v4072_v9 = vld [vmem:[#allocation13_spill] sm:$0xff] }
 0x1da   : > { %v1830_v63 = vpop.permute.xlu0 %1829 }
 0x1db   : > { %v1915_v17 = vsel %vm271_vm0, %v4061_v32, %v1830_v63  ;;  %v2287_v32 = vunpack.c.l.bf16 %v2303_v39 }
 0x1dc   : > { %v2011_v18 = vadd.f32 %v2247_v38, %v1915_v17 }
 0x1de   : > { %2043 = vst [vmem:[%s3801_s16 + $0x50] sm:$0xff] %v2011_v18  ;;  %v4073_v18 = vld [vmem:[#allocation31_spill] sm:$0xff] }
 0x1df   : > { %v1860_v51 = vpop.permute.xlu1 %1859 }
 0x1e0   : > { %v1930_v45 = vsel %vm271_vm0, %v4062_v3, %v1860_v51 }
 0x1e1   : > { %v2026_v27 = vadd.f32 %v2276_v24, %v1930_v45  ;;  %v4074_v45 = vld [vmem:[#allocation34_spill] sm:$0xff] }
 0x1e3   : > { %2058 = vst [vmem:[%s3801_s16 + $0xc8] sm:$0xff] %v2026_v27 }
 0x1e4   : > { %v1862_v49 = vpop.permute.xlu0 %1861 }
 0x1e5   : > { %v1931_v30 = vsel %vm271_vm0, %v4063_v61, %v1862_v49  ;;  %v2288_v49 = vunpack.c.h.bf16 %v2303_v39 }
 0x1e6   : > { %v2027_v43 = vadd.f32 %v2279_v41, %v1931_v30  ;;  %v4075_v30 = vld [vmem:[#allocation35_spill] sm:$0xff] }
 0x1e8   : > { %2059 = vst [vmem:[%s3801_s16 + $0xd0] sm:$0xff] %v2027_v43 }
 0x1e9   : > { %v1832_v23 = vpop.permute.xlu1 %1831 }
 0x1ea   : > { %v1916_v57 = vsel %vm271_vm0, %v4064_v7, %v1832_v23 }
 0x1eb   : > { %v2012_v48 = vadd.f32 %v2248_v52, %v1916_v57 }
 0x1ed   : > { %2044 = vst [vmem:[%s3801_s16 + $0x58] sm:$0xff] %v2012_v48 }
 0x1ee   : > { %v1834_v8 = vpop.permute.xlu0 %1833 }
 0x1ef   : > { %v1917_v33 = vsel %vm271_vm0, %v4065_v36, %v1834_v8 }
 0x1f0   : > { %v2013_v22 = vadd.f32 %v2251_v37, %v1917_v33 }
 0x1f2   : > { %2045 = vst [vmem:[%s3801_s16 + $0x60] sm:$0xff] %v2013_v22 }
 0x1f3   : > { %v1864_v53 = vpop.permute.xlu1 %1863 }
 0x1f4   : > { %v1932_v35 = vsel %vm271_vm0, %v4066_v16, %v1864_v53 }
 0x1f5   : > { %v2028_v40 = vadd.f32 %v2280_v44, %v1932_v35 }
 0x1f7   : > { %2060 = vst [vmem:[%s3801_s16 + $0xd8] sm:$0xff] %v2028_v40 }
 0x1f8   : > { %v1866_v58 = vpop.permute.xlu0 %1865 }
 0x1f9   : > { %v1933_v19 = vsel %vm271_vm0, %v4067_v5, %v1866_v58 }
 0x1fa   : > { %v2029_v59 = vadd.f32 %v2283_v56, %v1933_v19 }
 0x1fc   : > { %2061 = vst [vmem:[%s3801_s16 + $0xe0] sm:$0xff] %v2029_v59 }
 0x1fd   : > { %v1836_v42 = vpop.permute.xlu1 %1835 }
 0x1fe   : > { %v1918_v25 = vsel %vm271_vm0, %v4068_v20, %v1836_v42 }
 0x1ff   : > { %v2014_v60 = vadd.f32 %v2252_v47, %v1918_v25 }
 0x201   : > { %2046 = vst [vmem:[%s3801_s16 + $0x68] sm:$0xff] %v2014_v60 }
 0x202   : > { %v1842_v31 = vpop.permute.xlu0 %1841 }
 0x203   : > { %v1921_v13 = vsel %vm271_vm0, %v4069_v2, %v1842_v31 }
 0x204   : > { %v2017_v62 = vadd.f32 %v2259_v12, %v1921_v13 }
 0x206   : > { %2049 = vst [vmem:[%s3801_s16 + $0x80] sm:$0xff] %v2017_v62 }
 0x207   : > { %v1868_v21 = vpop.permute.xlu1 %1867 }
 0x208   : > { %v1934_v1 = vsel %vm271_vm0, %v4070_v15, %v1868_v21 }
 0x209   : > { %v2030_v50 = vadd.f32 %v2284_v54, %v1934_v1 }
 0x20b   : > { %2062 = vst [vmem:[%s3801_s16 + $0xe8] sm:$0xff] %v2030_v50 }
 0x20c   : > { %v1838_v0 = vpop.permute.xlu0 %1837 }
 0x20d   : > { %v1919_v55 = vsel %vm271_vm0, %v4071_v29, %v1838_v0 }
 0x20e   : > { %v2015_v14 = vadd.f32 %v2255_v6, %v1919_v55 }
 0x210   : > { %2047 = vst [vmem:[%s3801_s16 + $0x70] sm:$0xff] %v2015_v14 }
 0x211   : > { %v1844_v28 = vpop.permute.xlu1 %1843 }
 0x212   : > { %v1922_v38 = vsel %vm271_vm0, %v4072_v9, %v1844_v28 }
 0x213   : > { %v2018_v63 = vadd.f32 %v2260_v34, %v1922_v38 }
 0x215   : > { %2050 = vst [vmem:[%s3801_s16 + $0x88] sm:$0xff] %v2018_v63 }
 0x216   : > { %v1870_v17 = vpop.permute.xlu0 %1869 }
 0x217   : > { %v1935_v24 = vsel %vm271_vm0, %v4073_v18, %v1870_v17 }
 0x218   : > { %v2031_v51 = vadd.f32 %v2287_v32, %v1935_v24 }
 0x21a   : > { %2063 = vst [vmem:[%s3801_s16 + $0xf0] sm:$0xff] %v2031_v51 }
 0x21b   : > { %v1840_v3 = vpop.permute.xlu1 %1839 }
 0x21c   : > { %v1920_v27 = vsel %vm271_vm0, %v4074_v45, %v1840_v3 }
 0x21d   : > { %v2016_v41 = vadd.f32 %v2256_v11, %v1920_v27 }
 0x21f   : > { %2048 = vst [vmem:[%s3801_s16 + $0x78] sm:$0xff] %v2016_v41 }
 0x220   : > { %v1872_v61 = vpop.permute.xlu1 %1871 }
 0x221   : > { %v1936_v43 = vsel %vm271_vm0, %v4075_v30, %v1872_v61 }
 0x222   : > { %v2032_v52 = vadd.f32 %v2288_v49, %v1936_v43 }
 0x224   : > { %2064 = vst [vmem:[%s3801_s16 + $0xf8] sm:$0xff] %v2032_v52 }
 0x225   : > { %2458 = shalt.err (!%p2455_p3)
}
 0x226   : > { %s2459_s12 = scalar_lea.hbm %s3915_s28, 4096  ;;  %s2463_s17 = scalar_lea.hbm %s3968_s6, 8192 }
 0x227   : > { %p2460_p4 = scmp.ne.s32.totalorder %s3915_s28, %s2459_s12  ;;  %p2464_p9 = scmp.lt.s32.totalorder %s3915_s28, %s3968_s6 }
 0x228   : > { %p2465_p10 = scmp.lt.s32.totalorder %s2463_s17, %s2459_s12 }
 0x229   : > { %p2461_p7 = pnand %p2460_p4, %p2585_p5 }
 0x22a   : > { %p2466_p11 = por %p2465_p10, %p2464_p9 }
 0x22b   : > { %p2462_p8 = pneg %p2461_p7 }
 0x22d   : > { %p2467_p12 = pnand %p2466_p11, %p2462_p8 }
 0x22f   : > { %2470 = shalt.err (!%p2467_p12)
}
 0x230   : > { %s2510_s18 = smov 128   ;;  %s2511_s20 = smov 8  }
 0x231   : > { %2372 = dma.vmem_to_hbm [thread:$0]  (%p2585_p5), %s3917_s19, 4096, %s3915_s28, %s3922_s25, %s2510_s18, %s2510_s18, %s2511_s20  }
 0x232 PF: > { %p2378_p13 = scmp.ge.s32.totalorder %s2505_s24, 2  ;;  %s2094_s26 = sand.u32 1, %s2493_s21  }
 0x233   : > { %s2095_s29 = scalar_lea.sflag [#allocation4], %s2094_s26 }
 0x234   : > { %p2375_p0 = pnand %p2378_p13, %p2589_p6 }
 0x236   : > { %p2376_p1 = pneg %p2375_p0 }
 0x238   : > { %2488 = dma.done.wait (%p2376_p1), %s2095_s29, 4096  }
 0x239   : > { %2490 = vsyncadd (%p2376_p1), %s2095_s29, 4294963200  ;;  %p16_p2 = scmp.ge.s32.totalorder %s2572_s27, 4   ;;  %s4076_s21 = smov %s2497_s22 }
 0x23a   : > { %s4077_s22 = smov %s2501_s23  ;;  %s4078_s23 = smov %s2583_s30 }
 0x23b   : > { %s4079_s24 = smov %s2572_s27  ;;  %18 = sbr.rel (!%p16_p2) target bundleno = 3 (0x3), region = 93 }
 0x240   :  { %2100 = vsyncpa [#allocation4], 1 }
 0x241   :  { %2102 = vsyncpa [#allocation4 + $0x1], 1 }

</bundles_post_ra>
